<compile_context>
chip_gen: v6e
topology: v6e:2x2x1
jax: 0.10.0
libtpu: 0.0.40
codegen_flags: <defaults>
</compile_context>

<pallas_src>
import functools
import math

import jax
import jax.numpy as jnp
from jax import lax
from jax.experimental import pallas as pl
from jax.experimental.pallas import tpu as pltpu  # noqa: F401  (TPU backend)


# ----------------------------- Pallas kernel ------------------------------ #

def _make_fused_lstm_kernel(hidden_size, seq_len, batch, ndir):
    """One LSTM layer; both directions fused and interleaved in one program."""
    H, T, B = hidden_size, seq_len, batch

    def cell(gates, c):
        # PyTorch LSTM gate order: input, forget, cell(g), output.
        # TODO(synk): at production H (multiple of 128) these lane slices are
        # 128-aligned; at H=32 they are sub-vreg slices (acceptable at toy size).
        i = jax.nn.sigmoid(gates[:, 0:H])
        f = jax.nn.sigmoid(gates[:, H:2 * H])
        g = jnp.tanh(gates[:, 2 * H:3 * H])
        o = jax.nn.sigmoid(gates[:, 3 * H:4 * H])
        c_new = f * c + i * g
        return o * jnp.tanh(c_new), c_new

    def kernel(gx_ref, whh_ref, out_ref):
        # gx_ref : (ndir, T*B, 4H) bf16  -- x_t @ W_ih^T + (b_ih + b_hh), row t*B+b
        # whh_ref: (ndir, H, 4H)   bf16  -- W_hh^T per direction (pre-transposed)
        # out_ref: (T*B, ndir*H)   f32   -- each direction owns an H-wide stripe
        whh = [whh_ref[d] for d in range(ndir)]          # loaded once, hoisted
        h = [jnp.zeros((B, H), jnp.float32) for _ in range(ndir)]
        c = [jnp.zeros((B, H), jnp.float32) for _ in range(ndir)]

        # Fully static unrolled time loop: row offsets are Python constants and
        # the two direction chains are independent, so the scheduler interleaves
        # their MXU / EUP / VPU work and hides per-step latency.
        # TODO(synk): for production T (hundreds+), T-chunk the gate slab via
        # pltpu.emit_pipeline and use a bounded-unroll lax.fori_loop instead of
        # a full static unroll.
        for s in range(T):
            for d in range(ndir):
                t = s if d == 0 else T - 1 - s           # reverse dir walks back
                r = t * B
                gates = gx_ref[d, r:r + B, :].astype(jnp.float32) + jnp.dot(
                    h[d].astype(jnp.bfloat16), whh[d],
                    preferred_element_type=jnp.float32)
                h[d], c[d] = cell(gates, c[d])
                out_ref[r:r + B, d * H:(d + 1) * H] = h[d]

    return kernel


def lstm_layer(x_tmajor, dir_params):
    """One (possibly bidirectional) LSTM layer over a time-major input.

    x_tmajor:   (T, B, D_in) float32
    dir_params: list (len = num_directions) of dicts with
                wih_t (D_in, 4H) f32, whh_t (H, 4H) bf16, b (4H,) f32
    returns:    (T, B, num_directions * H) float32
    """
    T, B, _ = x_tmajor.shape
    ndir = len(dir_params)
    H = dir_params[0]["whh_t"].shape[0]

    # Hoisted input projection: one batched (T*B, D) x (D, 4H) matmul per
    # direction done by XLA in f32, stored as a dense bf16 (T*B, 4H) slab
    # (halves its HBM round trip and VMEM residency).
    gx = jnp.stack(
        [(jnp.einsum("tbd,dg->tbg", x_tmajor, p["wih_t"]) + p["b"])
             .reshape(T * B, 4 * H).astype(jnp.bfloat16)
         for p in dir_params],
        axis=0)                                                 # (ndir, T*B, 4H)
    whh = jnp.stack([p["whh_t"] for p in dir_params], axis=0)   # (ndir, H, 4H)

    # Gridless call: the (tiny) gate slab, weights and output are fully
    # VMEM-resident; both directions run fused in a single program.
    out = pl.pallas_call(
        _make_fused_lstm_kernel(H, T, B, ndir),
        out_shape=jax.ShapeDtypeStruct((T * B, ndir * H), jnp.float32),
    )(gx, whh)                                                  # (T*B, ndir*H)

    return out.reshape(T, B, ndir * H)


# --------------------------- Encoder forward ------------------------------ #

def recurrent_encoder_forward(x, lengths, params, num_layers, bidirectional):
    """Pallas-backed equivalent of RecurrentEncoder.forward (rnn_type='LSTM').

    x: (B, T, D) batch-first.  `lengths` is accepted but unused, exactly like
    the reference forward (which never packs the sequence).
    Returns out: (B, T, num_directions * H).
    """
    del lengths  # the reference forward ignores it as well
    ndir = 2 if bidirectional else 1

    h = jnp.transpose(x, (1, 0, 2))          # (B, T, D) -> (T, B, D)
    for layer in range(num_layers):
        h = lstm_layer(h, [params[(layer, d)] for d in range(ndir)])
        # TODO(synk): nn.LSTM inter-layer training dropout not implemented;
        # the module is configured with dropout=0.0 so semantics match.
    return jnp.transpose(h, (1, 0, 2))       # -> (B, T, ndir * H)


# ----------------------------- Pure-JAX refs ------------------------------- #

def _lstm_ref_direction(gx, whh_t, matched):
    """Scan one direction.  `matched=True` mirrors the kernel's bf16 casts."""
    H = whh_t.shape[0]
    B = gx.shape[1]

    def step(carry, gx_t):
        h, c = carry
        hd = h.astype(jnp.bfloat16) if matched else h
        gates = gx_t.astype(jnp.float32) + jnp.dot(
            hd, whh_t, preferred_element_type=jnp.float32)
        i = jax.nn.sigmoid(gates[:, 0:H])
        f = jax.nn.sigmoid(gates[:, H:2 * H])
        g = jnp.tanh(gates[:, 2 * H:3 * H])
        o = jax.nn.sigmoid(gates[:, 3 * H:4 * H])
        c = f * c + i * g
        h = o * jnp.tanh(c)
        return (h, c), h

    init = (jnp.zeros((B, H), jnp.float32), jnp.zeros((B, H), jnp.float32))
    _, hs = lax.scan(step, init, gx)
    return hs


def recurrent_encoder_ref(x, params, num_layers, bidirectional, matched):
    ndir = 2 if bidirectional else 1
    h = jnp.transpose(x, (1, 0, 2))
    for layer in range(num_layers):
        outs = []
        for d in range(ndir):
            p = params[(layer, d)]
            gx = jnp.einsum("tbd,dg->tbg", h, p["wih_t"]) + p["b"]
            whh = p["whh_t"] if matched else p["whh_t"].astype(jnp.float32)
            if matched:
                gx = gx.astype(jnp.bfloat16)
            if d == 1:
                gx = jnp.flip(gx, axis=0)
            o = _lstm_ref_direction(gx, whh, matched)
            if d == 1:
                o = jnp.flip(o, axis=0)
            outs.append(o)
        h = jnp.concatenate(outs, axis=-1)
    return jnp.transpose(h, (1, 0, 2))


# ------------------------------ Param init --------------------------------- #

def init_lstm_params(key, input_size, hidden_size, num_layers, bidirectional):
    """Deterministic init matching nn.LSTM parameter shapes.

    Per (layer, direction) PyTorch stores weight_ih (4H, in), weight_hh (4H, H),
    bias_ih (4H,), bias_hh (4H,).  Stored here pre-transposed / pre-summed:
    wih_t = weight_ih.T (f32), whh_t = weight_hh.T (bf16, MXU operand),
    b = bias_ih + bias_hh (f32).
    """
    ndir = 2 if bidirectional else 1
    bound = 1.0 / math.sqrt(hidden_size)
    params = {}
    for layer in range(num_layers):
        in_size = input_size if layer == 0 else hidden_size * ndir
        for d in range(ndir):
            key, k1, k2, k3, k4 = jax.random.split(key, 5)
            w_ih = jax.random.uniform(k1, (4 * hidden_size, in_size),
                                      jnp.float32, -bound, bound)
            w_hh = jax.random.uniform(k2, (4 * hidden_size, hidden_size),
                                      jnp.float32, -bound, bound)
            b_ih = jax.random.uniform(k3, (4 * hidden_size,),
                                      jnp.float32, -bound, bound)
            b_hh = jax.random.uniform(k4, (4 * hidden_size,),
                                      jnp.float32, -bound, bound)
            params[(layer, d)] = {
                "wih_t": w_ih.T,                           # (in, 4H) f32
                "whh_t": w_hh.T.astype(jnp.bfloat16),      # (H, 4H) bf16
                "b": b_ih + b_hh,                          # (4H,) f32
            }
    return params


# --------------------------------- main ------------------------------------ #

if __name__ == "__main__":
    # RecurrentEncoder('LSTM', input_size=32, hidden_size=32, num_layers=2,
    #                  batch_first=True, dropout=0.0, bidirectional=True,
    #                  hidden_init='zeros')
    B, T, D, H = 2, 8, 32, 32
    NUM_LAYERS = 2
    BIDIRECTIONAL = True
    NDIR = 2 if BIDIRECTIONAL else 1

    key = jax.random.PRNGKey(0)
    kx, kp = jax.random.split(key)
    x = jax.random.normal(kx, (B, T, D), jnp.float32)
    lengths = jnp.full((B,), T, jnp.int32)   # accepted but unused, as in ref
    params = init_lstm_params(kp, D, H, NUM_LAYERS, BIDIRECTIONAL)

    fwd = jax.jit(functools.partial(recurrent_encoder_forward,
                                    num_layers=NUM_LAYERS,
                                    bidirectional=BIDIRECTIONAL))
    out = jax.block_until_ready(fwd(x, lengths, params))
    assert out.shape == (B, T, NDIR * H), out.shape

    # Primary check: precision-matched pure-JAX reference (same bf16 gate slab
    # / bf16 W_hh operands, f32 gate math) -- validates gate order, reverse
    # time indexing, stripe writes and zero init.
    ref_m = jax.block_until_ready(
        recurrent_encoder_ref(x, params, NUM_LAYERS, BIDIRECTIONAL, matched=True))
    err_m = float(jnp.max(jnp.abs(out - ref_m)))
    assert jnp.allclose(out, ref_m, atol=2e-2, rtol=2e-2), err_m

    # Sanity check vs. an all-f32-compute reference (bf16 storage of the gate
    # slab / W_hh introduces ~1e-2-level deviations by design).
    ref_f = jax.block_until_ready(
        recurrent_encoder_ref(x, params, NUM_LAYERS, BIDIRECTIONAL, matched=False))
    err_f = float(jnp.max(jnp.abs(out - ref_f)))
    assert jnp.allclose(out, ref_f, atol=1e-1, rtol=1e-1), err_f

    print("KERNEL_OK")
</pallas_src>

<mosaic_0001>
module attributes {stable_mosaic.version = 11 : i64} {
  func.func @kernel(%arg0: memref<2x16x128xbf16, #tpu.memory_space<vmem>>, %arg1: memref<2x32x128xbf16, #tpu.memory_space<vmem>>, %arg2: memref<16x64xf32, #tpu.memory_space<vmem>>) attributes {dimension_semantics = [], scalar_prefetch = 0 : i64, scratch_operands = 0 : i64, tpu.core_type = #tpu.core_type<tc>} {
    %c0 = arith.constant 0 : index
    %c0_0 = arith.constant 0 : index
    %c0_1 = arith.constant 0 : index
    %0 = vector.load %arg1[%c0, %c0_0, %c0_1] : memref<2x32x128xbf16, #tpu.memory_space<vmem>>, vector<1x32x128xbf16>
    %1 = vector.shape_cast %0 : vector<1x32x128xbf16> to vector<32x128xbf16>
    %c1 = arith.constant 1 : index
    %c0_2 = arith.constant 0 : index
    %c0_3 = arith.constant 0 : index
    %2 = vector.load %arg1[%c1, %c0_2, %c0_3] : memref<2x32x128xbf16, #tpu.memory_space<vmem>>, vector<1x32x128xbf16>
    %3 = vector.shape_cast %2 : vector<1x32x128xbf16> to vector<32x128xbf16>
    %cst = arith.constant 0.000000e+00 : f32
    %4 = vector.broadcast %cst : f32 to vector<2x32xf32>
    %cst_4 = arith.constant 0.000000e+00 : f32
    %5 = vector.broadcast %cst_4 : f32 to vector<2x32xf32>
    %cst_5 = arith.constant 0.000000e+00 : f32
    %6 = vector.broadcast %cst_5 : f32 to vector<2x32xf32>
    %cst_6 = arith.constant 0.000000e+00 : f32
    %7 = vector.broadcast %cst_6 : f32 to vector<2x32xf32>
    %c0_7 = arith.constant 0 : index
    %c0_8 = arith.constant 0 : index
    %c0_9 = arith.constant 0 : index
    %8 = vector.load %arg0[%c0_7, %c0_8, %c0_9] : memref<2x16x128xbf16, #tpu.memory_space<vmem>>, vector<1x2x128xbf16>
    %9 = vector.shape_cast %8 : vector<1x2x128xbf16> to vector<2x128xbf16>
    %10 = arith.extf %9 : vector<2x128xbf16> to vector<2x128xf32>
    %11 = arith.truncf %4 : vector<2x32xf32> to vector<2x32xbf16>
    %cst_10 = arith.constant dense<0.000000e+00> : vector<2x128xf32>
    %12 = tpu.matmul %11, %1, %cst_10 {dimension_numbers = #tpu.dot_dimension_numbers<[1], [0], [0], [1], [0, 0, 1, 1], [], []>} : vector<2x32xbf16>, vector<32x128xbf16>, vector<2x128xf32> -> vector<2x128xf32>
    %13 = arith.addf %10, %12 : vector<2x128xf32>
    %14 = vector.extract_strided_slice %13 {offsets = [0, 0], sizes = [2, 32], strides = [1, 1]} : vector<2x128xf32> to vector<2x32xf32>
    %15 = arith.negf %14 : vector<2x32xf32>
    %16 = math.exp %15 : vector<2x32xf32>
    %cst_11 = arith.constant 1.000000e+00 : f32
    %17 = vector.broadcast %cst_11 : f32 to vector<2x32xf32>
    %18 = arith.addf %17, %16 : vector<2x32xf32>
    %19 = arith.divf %17, %18 : vector<2x32xf32>
    %20 = vector.extract_strided_slice %13 {offsets = [0, 32], sizes = [2, 32], strides = [1, 1]} : vector<2x128xf32> to vector<2x32xf32>
    %21 = arith.negf %20 : vector<2x32xf32>
    %22 = math.exp %21 : vector<2x32xf32>
    %cst_12 = arith.constant 1.000000e+00 : f32
    %23 = vector.broadcast %cst_12 : f32 to vector<2x32xf32>
    %24 = arith.addf %23, %22 : vector<2x32xf32>
    %25 = arith.divf %23, %24 : vector<2x32xf32>
    %26 = vector.extract_strided_slice %13 {offsets = [0, 64], sizes = [2, 32], strides = [1, 1]} : vector<2x128xf32> to vector<2x32xf32>
    %27 = math.tanh %26 : vector<2x32xf32>
    %28 = vector.extract_strided_slice %13 {offsets = [0, 96], sizes = [2, 32], strides = [1, 1]} : vector<2x128xf32> to vector<2x32xf32>
    %29 = arith.negf %28 : vector<2x32xf32>
    %30 = math.exp %29 : vector<2x32xf32>
    %cst_13 = arith.constant 1.000000e+00 : f32
    %31 = vector.broadcast %cst_13 : f32 to vector<2x32xf32>
    %32 = arith.addf %31, %30 : vector<2x32xf32>
    %33 = arith.divf %31, %32 : vector<2x32xf32>
    %34 = arith.mulf %25, %6 : vector<2x32xf32>
    %35 = arith.mulf %19, %27 : vector<2x32xf32>
    %36 = arith.addf %34, %35 : vector<2x32xf32>
    %37 = math.tanh %36 : vector<2x32xf32>
    %38 = arith.mulf %33, %37 : vector<2x32xf32>
    %c0_14 = arith.constant 0 : index
    %c0_15 = arith.constant 0 : index
    %39 = vector.load %arg2[%c0_14, %c0_15] : memref<16x64xf32, #tpu.memory_space<vmem>>, vector<2x32xf32>
    tpu.vector_store %arg2[%c0_14, %c0_15], %38 {strides = array<i32>} : memref<16x64xf32, #tpu.memory_space<vmem>>, vector<2x32xf32>,
    %c1_16 = arith.constant 1 : index
    %c14 = arith.constant 14 : index
    %c0_17 = arith.constant 0 : index
    %40 = vector.load %arg0[%c1_16, %c14, %c0_17] : memref<2x16x128xbf16, #tpu.memory_space<vmem>>, vector<1x2x128xbf16>
    %41 = vector.shape_cast %40 : vector<1x2x128xbf16> to vector<2x128xbf16>
    %42 = arith.extf %41 : vector<2x128xbf16> to vector<2x128xf32>
    %43 = arith.truncf %5 : vector<2x32xf32> to vector<2x32xbf16>
    %cst_18 = arith.constant dense<0.000000e+00> : vector<2x128xf32>
    %44 = tpu.matmul %43, %3, %cst_18 {dimension_numbers = #tpu.dot_dimension_numbers<[1], [0], [0], [1], [0, 0, 1, 1], [], []>} : vector<2x32xbf16>, vector<32x128xbf16>, vector<2x128xf32> -> vector<2x128xf32>
    %45 = arith.addf %42, %44 : vector<2x128xf32>
    %46 = vector.extract_strided_slice %45 {offsets = [0, 0], sizes = [2, 32], strides = [1, 1]} : vector<2x128xf32> to vector<2x32xf32>
    %47 = arith.negf %46 : vector<2x32xf32>
    %48 = math.exp %47 : vector<2x32xf32>
    %cst_19 = arith.constant 1.000000e+00 : f32
    %49 = vector.broadcast %cst_19 : f32 to vector<2x32xf32>
    %50 = arith.addf %49, %48 : vector<2x32xf32>
    %51 = arith.divf %49, %50 : vector<2x32xf32>
    %52 = vector.extract_strided_slice %45 {offsets = [0, 32], sizes = [2, 32], strides = [1, 1]} : vector<2x128xf32> to vector<2x32xf32>
    %53 = arith.negf %52 : vector<2x32xf32>
    %54 = math.exp %53 : vector<2x32xf32>
    %cst_20 = arith.constant 1.000000e+00 : f32
    %55 = vector.broadcast %cst_20 : f32 to vector<2x32xf32>
    %56 = arith.addf %55, %54 : vector<2x32xf32>
    %57 = arith.divf %55, %56 : vector<2x32xf32>
    %58 = vector.extract_strided_slice %45 {offsets = [0, 64], sizes = [2, 32], strides = [1, 1]} : vector<2x128xf32> to vector<2x32xf32>
    %59 = math.tanh %58 : vector<2x32xf32>
    %60 = vector.extract_strided_slice %45 {offsets = [0, 96], sizes = [2, 32], strides = [1, 1]} : vector<2x128xf32> to vector<2x32xf32>
    %61 = arith.negf %60 : vector<2x32xf32>
    %62 = math.exp %61 : vector<2x32xf32>
    %cst_21 = arith.constant 1.000000e+00 : f32
    %63 = vector.broadcast %cst_21 : f32 to vector<2x32xf32>
    %64 = arith.addf %63, %62 : vector<2x32xf32>
    %65 = arith.divf %63, %64 : vector<2x32xf32>
    %66 = arith.mulf %57, %7 : vector<2x32xf32>
    %67 = arith.mulf %51, %59 : vector<2x32xf32>
    %68 = arith.addf %66, %67 : vector<2x32xf32>
    %69 = math.tanh %68 : vector<2x32xf32>
    %70 = arith.mulf %65, %69 : vector<2x32xf32>
    %c14_22 = arith.constant 14 : index
    %c32 = arith.constant 32 : index
    %71 = vector.load %arg2[%c14_22, %c32] : memref<16x64xf32, #tpu.memory_space<vmem>>, vector<2x32xf32>
    tpu.vector_store %arg2[%c14_22, %c32], %70 {strides = array<i32>} : memref<16x64xf32, #tpu.memory_space<vmem>>, vector<2x32xf32>,
    %c0_23 = arith.constant 0 : index
    %c2 = arith.constant 2 : index
    %c0_24 = arith.constant 0 : index
    %72 = vector.load %arg0[%c0_23, %c2, %c0_24] : memref<2x16x128xbf16, #tpu.memory_space<vmem>>, vector<1x2x128xbf16>
    %73 = vector.shape_cast %72 : vector<1x2x128xbf16> to vector<2x128xbf16>
    %74 = arith.extf %73 : vector<2x128xbf16> to vector<2x128xf32>
    %75 = arith.truncf %38 : vector<2x32xf32> to vector<2x32xbf16>
    %cst_25 = arith.constant dense<0.000000e+00> : vector<2x128xf32>
    %76 = tpu.matmul %75, %1, %cst_25 {dimension_numbers = #tpu.dot_dimension_numbers<[1], [0], [0], [1], [0, 0, 1, 1], [], []>} : vector<2x32xbf16>, vector<32x128xbf16>, vector<2x128xf32> -> vector<2x128xf32>
    %77 = arith.addf %74, %76 : vector<2x128xf32>
    %78 = vector.extract_strided_slice %77 {offsets = [0, 0], sizes = [2, 32], strides = [1, 1]} : vector<2x128xf32> to vector<2x32xf32>
    %79 = arith.negf %78 : vector<2x32xf32>
    %80 = math.exp %79 : vector<2x32xf32>
    %cst_26 = arith.constant 1.000000e+00 : f32
    %81 = vector.broadcast %cst_26 : f32 to vector<2x32xf32>
    %82 = arith.addf %81, %80 : vector<2x32xf32>
    %83 = arith.divf %81, %82 : vector<2x32xf32>
    %84 = vector.extract_strided_slice %77 {offsets = [0, 32], sizes = [2, 32], strides = [1, 1]} : vector<2x128xf32> to vector<2x32xf32>
    %85 = arith.negf %84 : vector<2x32xf32>
    %86 = math.exp %85 : vector<2x32xf32>
    %cst_27 = arith.constant 1.000000e+00 : f32
    %87 = vector.broadcast %cst_27 : f32 to vector<2x32xf32>
    %88 = arith.addf %87, %86 : vector<2x32xf32>
    %89 = arith.divf %87, %88 : vector<2x32xf32>
    %90 = vector.extract_strided_slice %77 {offsets = [0, 64], sizes = [2, 32], strides = [1, 1]} : vector<2x128xf32> to vector<2x32xf32>
    %91 = math.tanh %90 : vector<2x32xf32>
    %92 = vector.extract_strided_slice %77 {offsets = [0, 96], sizes = [2, 32], strides = [1, 1]} : vector<2x128xf32> to vector<2x32xf32>
    %93 = arith.negf %92 : vector<2x32xf32>
    %94 = math.exp %93 : vector<2x32xf32>
    %cst_28 = arith.constant 1.000000e+00 : f32
    %95 = vector.broadcast %cst_28 : f32 to vector<2x32xf32>
    %96 = arith.addf %95, %94 : vector<2x32xf32>
    %97 = arith.divf %95, %96 : vector<2x32xf32>
    %98 = arith.mulf %89, %36 : vector<2x32xf32>
    %99 = arith.mulf %83, %91 : vector<2x32xf32>
    %100 = arith.addf %98, %99 : vector<2x32xf32>
    %101 = math.tanh %100 : vector<2x32xf32>
    %102 = arith.mulf %97, %101 : vector<2x32xf32>
    %c2_29 = arith.constant 2 : index
    %c0_30 = arith.constant 0 : index
    %103 = vector.load %arg2[%c2_29, %c0_30] : memref<16x64xf32, #tpu.memory_space<vmem>>, vector<2x32xf32>
    tpu.vector_store %arg2[%c2_29, %c0_30], %102 {strides = array<i32>} : memref<16x64xf32, #tpu.memory_space<vmem>>, vector<2x32xf32>,
    %c1_31 = arith.constant 1 : index
    %c12 = arith.constant 12 : index
    %c0_32 = arith.constant 0 : index
    %104 = vector.load %arg0[%c1_31, %c12, %c0_32] : memref<2x16x128xbf16, #tpu.memory_space<vmem>>, vector<1x2x128xbf16>
    %105 = vector.shape_cast %104 : vector<1x2x128xbf16> to vector<2x128xbf16>
    %106 = arith.extf %105 : vector<2x128xbf16> to vector<2x128xf32>
    %107 = arith.truncf %70 : vector<2x32xf32> to vector<2x32xbf16>
    %cst_33 = arith.constant dense<0.000000e+00> : vector<2x128xf32>
    %108 = tpu.matmul %107, %3, %cst_33 {dimension_numbers = #tpu.dot_dimension_numbers<[1], [0], [0], [1], [0, 0, 1, 1], [], []>} : vector<2x32xbf16>, vector<32x128xbf16>, vector<2x128xf32> -> vector<2x128xf32>
    %109 = arith.addf %106, %108 : vector<2x128xf32>
    %110 = vector.extract_strided_slice %109 {offsets = [0, 0], sizes = [2, 32], strides = [1, 1]} : vector<2x128xf32> to vector<2x32xf32>
    %111 = arith.negf %110 : vector<2x32xf32>
    %112 = math.exp %111 : vector<2x32xf32>
    %cst_34 = arith.constant 1.000000e+00 : f32
    %113 = vector.broadcast %cst_34 : f32 to vector<2x32xf32>
    %114 = arith.addf %113, %112 : vector<2x32xf32>
    %115 = arith.divf %113, %114 : vector<2x32xf32>
    %116 = vector.extract_strided_slice %109 {offsets = [0, 32], sizes = [2, 32], strides = [1, 1]} : vector<2x128xf32> to vector<2x32xf32>
    %117 = arith.negf %116 : vector<2x32xf32>
    %118 = math.exp %117 : vector<2x32xf32>
    %cst_35 = arith.constant 1.000000e+00 : f32
    %119 = vector.broadcast %cst_35 : f32 to vector<2x32xf32>
    %120 = arith.addf %119, %118 : vector<2x32xf32>
    %121 = arith.divf %119, %120 : vector<2x32xf32>
    %122 = vector.extract_strided_slice %109 {offsets = [0, 64], sizes = [2, 32], strides = [1, 1]} : vector<2x128xf32> to vector<2x32xf32>
    %123 = math.tanh %122 : vector<2x32xf32>
    %124 = vector.extract_strided_slice %109 {offsets = [0, 96], sizes = [2, 32], strides = [1, 1]} : vector<2x128xf32> to vector<2x32xf32>
    %125 = arith.negf %124 : vector<2x32xf32>
    %126 = math.exp %125 : vector<2x32xf32>
    %cst_36 = arith.constant 1.000000e+00 : f32
    %127 = vector.broadcast %cst_36 : f32 to vector<2x32xf32>
    %128 = arith.addf %127, %126 : vector<2x32xf32>
    %129 = arith.divf %127, %128 : vector<2x32xf32>
    %130 = arith.mulf %121, %68 : vector<2x32xf32>
    %131 = arith.mulf %115, %123 : vector<2x32xf32>
    %132 = arith.addf %130, %131 : vector<2x32xf32>
    %133 = math.tanh %132 : vector<2x32xf32>
    %134 = arith.mulf %129, %133 : vector<2x32xf32>
    %c12_37 = arith.constant 12 : index
    %c32_38 = arith.constant 32 : index
    %135 = vector.load %arg2[%c12_37, %c32_38] : memref<16x64xf32, #tpu.memory_space<vmem>>, vector<2x32xf32>
    tpu.vector_store %arg2[%c12_37, %c32_38], %134 {strides = array<i32>} : memref<16x64xf32, #tpu.memory_space<vmem>>, vector<2x32xf32>,
    %c0_39 = arith.constant 0 : index
    %c4 = arith.constant 4 : index
    %c0_40 = arith.constant 0 : index
    %136 = vector.load %arg0[%c0_39, %c4, %c0_40] : memref<2x16x128xbf16, #tpu.memory_space<vmem>>, vector<1x2x128xbf16>
    %137 = vector.shape_cast %136 : vector<1x2x128xbf16> to vector<2x128xbf16>
    %138 = arith.extf %137 : vector<2x128xbf16> to vector<2x128xf32>
    %139 = arith.truncf %102 : vector<2x32xf32> to vector<2x32xbf16>
    %cst_41 = arith.constant dense<0.000000e+00> : vector<2x128xf32>
    %140 = tpu.matmul %139, %1, %cst_41 {dimension_numbers = #tpu.dot_dimension_numbers<[1], [0], [0], [1], [0, 0, 1, 1], [], []>} : vector<2x32xbf16>, vector<32x128xbf16>, vector<2x128xf32> -> vector<2x128xf32>
    %141 = arith.addf %138, %140 : vector<2x128xf32>
    %142 = vector.extract_strided_slice %141 {offsets = [0, 0], sizes = [2, 32], strides = [1, 1]} : vector<2x128xf32> to vector<2x32xf32>
    %143 = arith.negf %142 : vector<2x32xf32>
    %144 = math.exp %143 : vector<2x32xf32>
    %cst_42 = arith.constant 1.000000e+00 : f32
    %145 = vector.broadcast %cst_42 : f32 to vector<2x32xf32>
    %146 = arith.addf %145, %144 : vector<2x32xf32>
    %147 = arith.divf %145, %146 : vector<2x32xf32>
    %148 = vector.extract_strided_slice %141 {offsets = [0, 32], sizes = [2, 32], strides = [1, 1]} : vector<2x128xf32> to vector<2x32xf32>
    %149 = arith.negf %148 : vector<2x32xf32>
    %150 = math.exp %149 : vector<2x32xf32>
    %cst_43 = arith.constant 1.000000e+00 : f32
    %151 = vector.broadcast %cst_43 : f32 to vector<2x32xf32>
    %152 = arith.addf %151, %150 : vector<2x32xf32>
    %153 = arith.divf %151, %152 : vector<2x32xf32>
    %154 = vector.extract_strided_slice %141 {offsets = [0, 64], sizes = [2, 32], strides = [1, 1]} : vector<2x128xf32> to vector<2x32xf32>
    %155 = math.tanh %154 : vector<2x32xf32>
    %156 = vector.extract_strided_slice %141 {offsets = [0, 96], sizes = [2, 32], strides = [1, 1]} : vector<2x128xf32> to vector<2x32xf32>
    %157 = arith.negf %156 : vector<2x32xf32>
    %158 = math.exp %157 : vector<2x32xf32>
    %cst_44 = arith.constant 1.000000e+00 : f32
    %159 = vector.broadcast %cst_44 : f32 to vector<2x32xf32>
    %160 = arith.addf %159, %158 : vector<2x32xf32>
    %161 = arith.divf %159, %160 : vector<2x32xf32>
    %162 = arith.mulf %153, %100 : vector<2x32xf32>
    %163 = arith.mulf %147, %155 : vector<2x32xf32>
    %164 = arith.addf %162, %163 : vector<2x32xf32>
    %165 = math.tanh %164 : vector<2x32xf32>
    %166 = arith.mulf %161, %165 : vector<2x32xf32>
    %c4_45 = arith.constant 4 : index
    %c0_46 = arith.constant 0 : index
    %167 = vector.load %arg2[%c4_45, %c0_46] : memref<16x64xf32, #tpu.memory_space<vmem>>, vector<2x32xf32>
    tpu.vector_store %arg2[%c4_45, %c0_46], %166 {strides = array<i32>} : memref<16x64xf32, #tpu.memory_space<vmem>>, vector<2x32xf32>,
    %c1_47 = arith.constant 1 : index
    %c10 = arith.constant 10 : index
    %c0_48 = arith.constant 0 : index
    %168 = vector.load %arg0[%c1_47, %c10, %c0_48] : memref<2x16x128xbf16, #tpu.memory_space<vmem>>, vector<1x2x128xbf16>
    %169 = vector.shape_cast %168 : vector<1x2x128xbf16> to vector<2x128xbf16>
    %170 = arith.extf %169 : vector<2x128xbf16> to vector<2x128xf32>
    %171 = arith.truncf %134 : vector<2x32xf32> to vector<2x32xbf16>
    %cst_49 = arith.constant dense<0.000000e+00> : vector<2x128xf32>
    %172 = tpu.matmul %171, %3, %cst_49 {dimension_numbers = #tpu.dot_dimension_numbers<[1], [0], [0], [1], [0, 0, 1, 1], [], []>} : vector<2x32xbf16>, vector<32x128xbf16>, vector<2x128xf32> -> vector<2x128xf32>
    %173 = arith.addf %170, %172 : vector<2x128xf32>
    %174 = vector.extract_strided_slice %173 {offsets = [0, 0], sizes = [2, 32], strides = [1, 1]} : vector<2x128xf32> to vector<2x32xf32>
    %175 = arith.negf %174 : vector<2x32xf32>
    %176 = math.exp %175 : vector<2x32xf32>
    %cst_50 = arith.constant 1.000000e+00 : f32
    %177 = vector.broadcast %cst_50 : f32 to vector<2x32xf32>
    %178 = arith.addf %177, %176 : vector<2x32xf32>
    %179 = arith.divf %177, %178 : vector<2x32xf32>
    %180 = vector.extract_strided_slice %173 {offsets = [0, 32], sizes = [2, 32], strides = [1, 1]} : vector<2x128xf32> to vector<2x32xf32>
    %181 = arith.negf %180 : vector<2x32xf32>
    %182 = math.exp %181 : vector<2x32xf32>
    %cst_51 = arith.constant 1.000000e+00 : f32
    %183 = vector.broadcast %cst_51 : f32 to vector<2x32xf32>
    %184 = arith.addf %183, %182 : vector<2x32xf32>
    %185 = arith.divf %183, %184 : vector<2x32xf32>
    %186 = vector.extract_strided_slice %173 {offsets = [0, 64], sizes = [2, 32], strides = [1, 1]} : vector<2x128xf32> to vector<2x32xf32>
    %187 = math.tanh %186 : vector<2x32xf32>
    %188 = vector.extract_strided_slice %173 {offsets = [0, 96], sizes = [2, 32], strides = [1, 1]} : vector<2x128xf32> to vector<2x32xf32>
    %189 = arith.negf %188 : vector<2x32xf32>
    %190 = math.exp %189 : vector<2x32xf32>
    %cst_52 = arith.constant 1.000000e+00 : f32
    %191 = vector.broadcast %cst_52 : f32 to vector<2x32xf32>
    %192 = arith.addf %191, %190 : vector<2x32xf32>
    %193 = arith.divf %191, %192 : vector<2x32xf32>
    %194 = arith.mulf %185, %132 : vector<2x32xf32>
    %195 = arith.mulf %179, %187 : vector<2x32xf32>
    %196 = arith.addf %194, %195 : vector<2x32xf32>
    %197 = math.tanh %196 : vector<2x32xf32>
    %198 = arith.mulf %193, %197 : vector<2x32xf32>
    %c10_53 = arith.constant 10 : index
    %c32_54 = arith.constant 32 : index
    %199 = vector.load %arg2[%c10_53, %c32_54] : memref<16x64xf32, #tpu.memory_space<vmem>>, vector<2x32xf32>
    tpu.vector_store %arg2[%c10_53, %c32_54], %198 {strides = array<i32>} : memref<16x64xf32, #tpu.memory_space<vmem>>, vector<2x32xf32>,
    %c0_55 = arith.constant 0 : index
    %c6 = arith.constant 6 : index
    %c0_56 = arith.constant 0 : index
    %200 = vector.load %arg0[%c0_55, %c6, %c0_56] : memref<2x16x128xbf16, #tpu.memory_space<vmem>>, vector<1x2x128xbf16>
    %201 = vector.shape_cast %200 : vector<1x2x128xbf16> to vector<2x128xbf16>
    %202 = arith.extf %201 : vector<2x128xbf16> to vector<2x128xf32>
    %203 = arith.truncf %166 : vector<2x32xf32> to vector<2x32xbf16>
    %cst_57 = arith.constant dense<0.000000e+00> : vector<2x128xf32>
    %204 = tpu.matmul %203, %1, %cst_57 {dimension_numbers = #tpu.dot_dimension_numbers<[1], [0], [0], [1], [0, 0, 1, 1], [], []>} : vector<2x32xbf16>, vector<32x128xbf16>, vector<2x128xf32> -> vector<2x128xf32>
    %205 = arith.addf %202, %204 : vector<2x128xf32>
    %206 = vector.extract_strided_slice %205 {offsets = [0, 0], sizes = [2, 32], strides = [1, 1]} : vector<2x128xf32> to vector<2x32xf32>
    %207 = arith.negf %206 : vector<2x32xf32>
    %208 = math.exp %207 : vector<2x32xf32>
    %cst_58 = arith.constant 1.000000e+00 : f32
    %209 = vector.broadcast %cst_58 : f32 to vector<2x32xf32>
    %210 = arith.addf %209, %208 : vector<2x32xf32>
    %211 = arith.divf %209, %210 : vector<2x32xf32>
    %212 = vector.extract_strided_slice %205 {offsets = [0, 32], sizes = [2, 32], strides = [1, 1]} : vector<2x128xf32> to vector<2x32xf32>
    %213 = arith.negf %212 : vector<2x32xf32>
    %214 = math.exp %213 : vector<2x32xf32>
    %cst_59 = arith.constant 1.000000e+00 : f32
    %215 = vector.broadcast %cst_59 : f32 to vector<2x32xf32>
    %216 = arith.addf %215, %214 : vector<2x32xf32>
    %217 = arith.divf %215, %216 : vector<2x32xf32>
    %218 = vector.extract_strided_slice %205 {offsets = [0, 64], sizes = [2, 32], strides = [1, 1]} : vector<2x128xf32> to vector<2x32xf32>
    %219 = math.tanh %218 : vector<2x32xf32>
    %220 = vector.extract_strided_slice %205 {offsets = [0, 96], sizes = [2, 32], strides = [1, 1]} : vector<2x128xf32> to vector<2x32xf32>
    %221 = arith.negf %220 : vector<2x32xf32>
    %222 = math.exp %221 : vector<2x32xf32>
    %cst_60 = arith.constant 1.000000e+00 : f32
    %223 = vector.broadcast %cst_60 : f32 to vector<2x32xf32>
    %224 = arith.addf %223, %222 : vector<2x32xf32>
    %225 = arith.divf %223, %224 : vector<2x32xf32>
    %226 = arith.mulf %217, %164 : vector<2x32xf32>
    %227 = arith.mulf %211, %219 : vector<2x32xf32>
    %228 = arith.addf %226, %227 : vector<2x32xf32>
    %229 = math.tanh %228 : vector<2x32xf32>
    %230 = arith.mulf %225, %229 : vector<2x32xf32>
    %c6_61 = arith.constant 6 : index
    %c0_62 = arith.constant 0 : index
    %231 = vector.load %arg2[%c6_61, %c0_62] : memref<16x64xf32, #tpu.memory_space<vmem>>, vector<2x32xf32>
    tpu.vector_store %arg2[%c6_61, %c0_62], %230 {strides = array<i32>} : memref<16x64xf32, #tpu.memory_space<vmem>>, vector<2x32xf32>,
    %c1_63 = arith.constant 1 : index
    %c8 = arith.constant 8 : index
    %c0_64 = arith.constant 0 : index
    %232 = vector.load %arg0[%c1_63, %c8, %c0_64] : memref<2x16x128xbf16, #tpu.memory_space<vmem>>, vector<1x2x128xbf16>
    %233 = vector.shape_cast %232 : vector<1x2x128xbf16> to vector<2x128xbf16>
    %234 = arith.extf %233 : vector<2x128xbf16> to vector<2x128xf32>
    %235 = arith.truncf %198 : vector<2x32xf32> to vector<2x32xbf16>
    %cst_65 = arith.constant dense<0.000000e+00> : vector<2x128xf32>
    %236 = tpu.matmul %235, %3, %cst_65 {dimension_numbers = #tpu.dot_dimension_numbers<[1], [0], [0], [1], [0, 0, 1, 1], [], []>} : vector<2x32xbf16>, vector<32x128xbf16>, vector<2x128xf32> -> vector<2x128xf32>
    %237 = arith.addf %234, %236 : vector<2x128xf32>
    %238 = vector.extract_strided_slice %237 {offsets = [0, 0], sizes = [2, 32], strides = [1, 1]} : vector<2x128xf32> to vector<2x32xf32>
    %239 = arith.negf %238 : vector<2x32xf32>
    %240 = math.exp %239 : vector<2x32xf32>
    %cst_66 = arith.constant 1.000000e+00 : f32
    %241 = vector.broadcast %cst_66 : f32 to vector<2x32xf32>
    %242 = arith.addf %241, %240 : vector<2x32xf32>
    %243 = arith.divf %241, %242 : vector<2x32xf32>
    %244 = vector.extract_strided_slice %237 {offsets = [0, 32], sizes = [2, 32], strides = [1, 1]} : vector<2x128xf32> to vector<2x32xf32>
    %245 = arith.negf %244 : vector<2x32xf32>
    %246 = math.exp %245 : vector<2x32xf32>
    %cst_67 = arith.constant 1.000000e+00 : f32
    %247 = vector.broadcast %cst_67 : f32 to vector<2x32xf32>
    %248 = arith.addf %247, %246 : vector<2x32xf32>
    %249 = arith.divf %247, %248 : vector<2x32xf32>
    %250 = vector.extract_strided_slice %237 {offsets = [0, 64], sizes = [2, 32], strides = [1, 1]} : vector<2x128xf32> to vector<2x32xf32>
    %251 = math.tanh %250 : vector<2x32xf32>
    %252 = vector.extract_strided_slice %237 {offsets = [0, 96], sizes = [2, 32], strides = [1, 1]} : vector<2x128xf32> to vector<2x32xf32>
    %253 = arith.negf %252 : vector<2x32xf32>
    %254 = math.exp %253 : vector<2x32xf32>
    %cst_68 = arith.constant 1.000000e+00 : f32
    %255 = vector.broadcast %cst_68 : f32 to vector<2x32xf32>
    %256 = arith.addf %255, %254 : vector<2x32xf32>
    %257 = arith.divf %255, %256 : vector<2x32xf32>
    %258 = arith.mulf %249, %196 : vector<2x32xf32>
    %259 = arith.mulf %243, %251 : vector<2x32xf32>
    %260 = arith.addf %258, %259 : vector<2x32xf32>
    %261 = math.tanh %260 : vector<2x32xf32>
    %262 = arith.mulf %257, %261 : vector<2x32xf32>
    %c8_69 = arith.constant 8 : index
    %c32_70 = arith.constant 32 : index
    %263 = vector.load %arg2[%c8_69, %c32_70] : memref<16x64xf32, #tpu.memory_space<vmem>>, vector<2x32xf32>
    tpu.vector_store %arg2[%c8_69, %c32_70], %262 {strides = array<i32>} : memref<16x64xf32, #tpu.memory_space<vmem>>, vector<2x32xf32>,
    %c0_71 = arith.constant 0 : index
    %c8_72 = arith.constant 8 : index
    %c0_73 = arith.constant 0 : index
    %264 = vector.load %arg0[%c0_71, %c8_72, %c0_73] : memref<2x16x128xbf16, #tpu.memory_space<vmem>>, vector<1x2x128xbf16>
    %265 = vector.shape_cast %264 : vector<1x2x128xbf16> to vector<2x128xbf16>
    %266 = arith.extf %265 : vector<2x128xbf16> to vector<2x128xf32>
    %267 = arith.truncf %230 : vector<2x32xf32> to vector<2x32xbf16>
    %cst_74 = arith.constant dense<0.000000e+00> : vector<2x128xf32>
    %268 = tpu.matmul %267, %1, %cst_74 {dimension_numbers = #tpu.dot_dimension_numbers<[1], [0], [0], [1], [0, 0, 1, 1], [], []>} : vector<2x32xbf16>, vector<32x128xbf16>, vector<2x128xf32> -> vector<2x128xf32>
    %269 = arith.addf %266, %268 : vector<2x128xf32>
    %270 = vector.extract_strided_slice %269 {offsets = [0, 0], sizes = [2, 32], strides = [1, 1]} : vector<2x128xf32> to vector<2x32xf32>
    %271 = arith.negf %270 : vector<2x32xf32>
    %272 = math.exp %271 : vector<2x32xf32>
    %cst_75 = arith.constant 1.000000e+00 : f32
    %273 = vector.broadcast %cst_75 : f32 to vector<2x32xf32>
    %274 = arith.addf %273, %272 : vector<2x32xf32>
    %275 = arith.divf %273, %274 : vector<2x32xf32>
    %276 = vector.extract_strided_slice %269 {offsets = [0, 32], sizes = [2, 32], strides = [1, 1]} : vector<2x128xf32> to vector<2x32xf32>
    %277 = arith.negf %276 : vector<2x32xf32>
    %278 = math.exp %277 : vector<2x32xf32>
    %cst_76 = arith.constant 1.000000e+00 : f32
    %279 = vector.broadcast %cst_76 : f32 to vector<2x32xf32>
    %280 = arith.addf %279, %278 : vector<2x32xf32>
    %281 = arith.divf %279, %280 : vector<2x32xf32>
    %282 = vector.extract_strided_slice %269 {offsets = [0, 64], sizes = [2, 32], strides = [1, 1]} : vector<2x128xf32> to vector<2x32xf32>
    %283 = math.tanh %282 : vector<2x32xf32>
    %284 = vector.extract_strided_slice %269 {offsets = [0, 96], sizes = [2, 32], strides = [1, 1]} : vector<2x128xf32> to vector<2x32xf32>
    %285 = arith.negf %284 : vector<2x32xf32>
    %286 = math.exp %285 : vector<2x32xf32>
    %cst_77 = arith.constant 1.000000e+00 : f32
    %287 = vector.broadcast %cst_77 : f32 to vector<2x32xf32>
    %288 = arith.addf %287, %286 : vector<2x32xf32>
    %289 = arith.divf %287, %288 : vector<2x32xf32>
    %290 = arith.mulf %281, %228 : vector<2x32xf32>
    %291 = arith.mulf %275, %283 : vector<2x32xf32>
    %292 = arith.addf %290, %291 : vector<2x32xf32>
    %293 = math.tanh %292 : vector<2x32xf32>
    %294 = arith.mulf %289, %293 : vector<2x32xf32>
    %c8_78 = arith.constant 8 : index
    %c0_79 = arith.constant 0 : index
    %295 = vector.load %arg2[%c8_78, %c0_79] : memref<16x64xf32, #tpu.memory_space<vmem>>, vector<2x32xf32>
    tpu.vector_store %arg2[%c8_78, %c0_79], %294 {strides = array<i32>} : memref<16x64xf32, #tpu.memory_space<vmem>>, vector<2x32xf32>,
    %c1_80 = arith.constant 1 : index
    %c6_81 = arith.constant 6 : index
    %c0_82 = arith.constant 0 : index
    %296 = vector.load %arg0[%c1_80, %c6_81, %c0_82] : memref<2x16x128xbf16, #tpu.memory_space<vmem>>, vector<1x2x128xbf16>
    %297 = vector.shape_cast %296 : vector<1x2x128xbf16> to vector<2x128xbf16>
    %298 = arith.extf %297 : vector<2x128xbf16> to vector<2x128xf32>
    %299 = arith.truncf %262 : vector<2x32xf32> to vector<2x32xbf16>
    %cst_83 = arith.constant dense<0.000000e+00> : vector<2x128xf32>
    %300 = tpu.matmul %299, %3, %cst_83 {dimension_numbers = #tpu.dot_dimension_numbers<[1], [0], [0], [1], [0, 0, 1, 1], [], []>} : vector<2x32xbf16>, vector<32x128xbf16>, vector<2x128xf32> -> vector<2x128xf32>
    %301 = arith.addf %298, %300 : vector<2x128xf32>
    %302 = vector.extract_strided_slice %301 {offsets = [0, 0], sizes = [2, 32], strides = [1, 1]} : vector<2x128xf32> to vector<2x32xf32>
    %303 = arith.negf %302 : vector<2x32xf32>
    %304 = math.exp %303 : vector<2x32xf32>
    %cst_84 = arith.constant 1.000000e+00 : f32
    %305 = vector.broadcast %cst_84 : f32 to vector<2x32xf32>
    %306 = arith.addf %305, %304 : vector<2x32xf32>
    %307 = arith.divf %305, %306 : vector<2x32xf32>
    %308 = vector.extract_strided_slice %301 {offsets = [0, 32], sizes = [2, 32], strides = [1, 1]} : vector<2x128xf32> to vector<2x32xf32>
    %309 = arith.negf %308 : vector<2x32xf32>
    %310 = math.exp %309 : vector<2x32xf32>
    %cst_85 = arith.constant 1.000000e+00 : f32
    %311 = vector.broadcast %cst_85 : f32 to vector<2x32xf32>
    %312 = arith.addf %311, %310 : vector<2x32xf32>
    %313 = arith.divf %311, %312 : vector<2x32xf32>
    %314 = vector.extract_strided_slice %301 {offsets = [0, 64], sizes = [2, 32], strides = [1, 1]} : vector<2x128xf32> to vector<2x32xf32>
    %315 = math.tanh %314 : vector<2x32xf32>
    %316 = vector.extract_strided_slice %301 {offsets = [0, 96], sizes = [2, 32], strides = [1, 1]} : vector<2x128xf32> to vector<2x32xf32>
    %317 = arith.negf %316 : vector<2x32xf32>
    %318 = math.exp %317 : vector<2x32xf32>
    %cst_86 = arith.constant 1.000000e+00 : f32
    %319 = vector.broadcast %cst_86 : f32 to vector<2x32xf32>
    %320 = arith.addf %319, %318 : vector<2x32xf32>
    %321 = arith.divf %319, %320 : vector<2x32xf32>
    %322 = arith.mulf %313, %260 : vector<2x32xf32>
    %323 = arith.mulf %307, %315 : vector<2x32xf32>
    %324 = arith.addf %322, %323 : vector<2x32xf32>
    %325 = math.tanh %324 : vector<2x32xf32>
    %326 = arith.mulf %321, %325 : vector<2x32xf32>
    %c6_87 = arith.constant 6 : index
    %c32_88 = arith.constant 32 : index
    %327 = vector.load %arg2[%c6_87, %c32_88] : memref<16x64xf32, #tpu.memory_space<vmem>>, vector<2x32xf32>
    tpu.vector_store %arg2[%c6_87, %c32_88], %326 {strides = array<i32>} : memref<16x64xf32, #tpu.memory_space<vmem>>, vector<2x32xf32>,
    %c0_89 = arith.constant 0 : index
    %c10_90 = arith.constant 10 : index
    %c0_91 = arith.constant 0 : index
    %328 = vector.load %arg0[%c0_89, %c10_90, %c0_91] : memref<2x16x128xbf16, #tpu.memory_space<vmem>>, vector<1x2x128xbf16>
    %329 = vector.shape_cast %328 : vector<1x2x128xbf16> to vector<2x128xbf16>
    %330 = arith.extf %329 : vector<2x128xbf16> to vector<2x128xf32>
    %331 = arith.truncf %294 : vector<2x32xf32> to vector<2x32xbf16>
    %cst_92 = arith.constant dense<0.000000e+00> : vector<2x128xf32>
    %332 = tpu.matmul %331, %1, %cst_92 {dimension_numbers = #tpu.dot_dimension_numbers<[1], [0], [0], [1], [0, 0, 1, 1], [], []>} : vector<2x32xbf16>, vector<32x128xbf16>, vector<2x128xf32> -> vector<2x128xf32>
    %333 = arith.addf %330, %332 : vector<2x128xf32>
    %334 = vector.extract_strided_slice %333 {offsets = [0, 0], sizes = [2, 32], strides = [1, 1]} : vector<2x128xf32> to vector<2x32xf32>
    %335 = arith.negf %334 : vector<2x32xf32>
    %336 = math.exp %335 : vector<2x32xf32>
    %cst_93 = arith.constant 1.000000e+00 : f32
    %337 = vector.broadcast %cst_93 : f32 to vector<2x32xf32>
    %338 = arith.addf %337, %336 : vector<2x32xf32>
    %339 = arith.divf %337, %338 : vector<2x32xf32>
    %340 = vector.extract_strided_slice %333 {offsets = [0, 32], sizes = [2, 32], strides = [1, 1]} : vector<2x128xf32> to vector<2x32xf32>
    %341 = arith.negf %340 : vector<2x32xf32>
    %342 = math.exp %341 : vector<2x32xf32>
    %cst_94 = arith.constant 1.000000e+00 : f32
    %343 = vector.broadcast %cst_94 : f32 to vector<2x32xf32>
    %344 = arith.addf %343, %342 : vector<2x32xf32>
    %345 = arith.divf %343, %344 : vector<2x32xf32>
    %346 = vector.extract_strided_slice %333 {offsets = [0, 64], sizes = [2, 32], strides = [1, 1]} : vector<2x128xf32> to vector<2x32xf32>
    %347 = math.tanh %346 : vector<2x32xf32>
    %348 = vector.extract_strided_slice %333 {offsets = [0, 96], sizes = [2, 32], strides = [1, 1]} : vector<2x128xf32> to vector<2x32xf32>
    %349 = arith.negf %348 : vector<2x32xf32>
    %350 = math.exp %349 : vector<2x32xf32>
    %cst_95 = arith.constant 1.000000e+00 : f32
    %351 = vector.broadcast %cst_95 : f32 to vector<2x32xf32>
    %352 = arith.addf %351, %350 : vector<2x32xf32>
    %353 = arith.divf %351, %352 : vector<2x32xf32>
    %354 = arith.mulf %345, %292 : vector<2x32xf32>
    %355 = arith.mulf %339, %347 : vector<2x32xf32>
    %356 = arith.addf %354, %355 : vector<2x32xf32>
    %357 = math.tanh %356 : vector<2x32xf32>
    %358 = arith.mulf %353, %357 : vector<2x32xf32>
    %c10_96 = arith.constant 10 : index
    %c0_97 = arith.constant 0 : index
    %359 = vector.load %arg2[%c10_96, %c0_97] : memref<16x64xf32, #tpu.memory_space<vmem>>, vector<2x32xf32>
    tpu.vector_store %arg2[%c10_96, %c0_97], %358 {strides = array<i32>} : memref<16x64xf32, #tpu.memory_space<vmem>>, vector<2x32xf32>,
    %c1_98 = arith.constant 1 : index
    %c4_99 = arith.constant 4 : index
    %c0_100 = arith.constant 0 : index
    %360 = vector.load %arg0[%c1_98, %c4_99, %c0_100] : memref<2x16x128xbf16, #tpu.memory_space<vmem>>, vector<1x2x128xbf16>
    %361 = vector.shape_cast %360 : vector<1x2x128xbf16> to vector<2x128xbf16>
    %362 = arith.extf %361 : vector<2x128xbf16> to vector<2x128xf32>
    %363 = arith.truncf %326 : vector<2x32xf32> to vector<2x32xbf16>
    %cst_101 = arith.constant dense<0.000000e+00> : vector<2x128xf32>
    %364 = tpu.matmul %363, %3, %cst_101 {dimension_numbers = #tpu.dot_dimension_numbers<[1], [0], [0], [1], [0, 0, 1, 1], [], []>} : vector<2x32xbf16>, vector<32x128xbf16>, vector<2x128xf32> -> vector<2x128xf32>
    %365 = arith.addf %362, %364 : vector<2x128xf32>
    %366 = vector.extract_strided_slice %365 {offsets = [0, 0], sizes = [2, 32], strides = [1, 1]} : vector<2x128xf32> to vector<2x32xf32>
    %367 = arith.negf %366 : vector<2x32xf32>
    %368 = math.exp %367 : vector<2x32xf32>
    %cst_102 = arith.constant 1.000000e+00 : f32
    %369 = vector.broadcast %cst_102 : f32 to vector<2x32xf32>
    %370 = arith.addf %369, %368 : vector<2x32xf32>
    %371 = arith.divf %369, %370 : vector<2x32xf32>
    %372 = vector.extract_strided_slice %365 {offsets = [0, 32], sizes = [2, 32], strides = [1, 1]} : vector<2x128xf32> to vector<2x32xf32>
    %373 = arith.negf %372 : vector<2x32xf32>
    %374 = math.exp %373 : vector<2x32xf32>
    %cst_103 = arith.constant 1.000000e+00 : f32
    %375 = vector.broadcast %cst_103 : f32 to vector<2x32xf32>
    %376 = arith.addf %375, %374 : vector<2x32xf32>
    %377 = arith.divf %375, %376 : vector<2x32xf32>
    %378 = vector.extract_strided_slice %365 {offsets = [0, 64], sizes = [2, 32], strides = [1, 1]} : vector<2x128xf32> to vector<2x32xf32>
    %379 = math.tanh %378 : vector<2x32xf32>
    %380 = vector.extract_strided_slice %365 {offsets = [0, 96], sizes = [2, 32], strides = [1, 1]} : vector<2x128xf32> to vector<2x32xf32>
    %381 = arith.negf %380 : vector<2x32xf32>
    %382 = math.exp %381 : vector<2x32xf32>
    %cst_104 = arith.constant 1.000000e+00 : f32
    %383 = vector.broadcast %cst_104 : f32 to vector<2x32xf32>
    %384 = arith.addf %383, %382 : vector<2x32xf32>
    %385 = arith.divf %383, %384 : vector<2x32xf32>
    %386 = arith.mulf %377, %324 : vector<2x32xf32>
    %387 = arith.mulf %371, %379 : vector<2x32xf32>
    %388 = arith.addf %386, %387 : vector<2x32xf32>
    %389 = math.tanh %388 : vector<2x32xf32>
    %390 = arith.mulf %385, %389 : vector<2x32xf32>
    %c4_105 = arith.constant 4 : index
    %c32_106 = arith.constant 32 : index
    %391 = vector.load %arg2[%c4_105, %c32_106] : memref<16x64xf32, #tpu.memory_space<vmem>>, vector<2x32xf32>
    tpu.vector_store %arg2[%c4_105, %c32_106], %390 {strides = array<i32>} : memref<16x64xf32, #tpu.memory_space<vmem>>, vector<2x32xf32>,
    %c0_107 = arith.constant 0 : index
    %c12_108 = arith.constant 12 : index
    %c0_109 = arith.constant 0 : index
    %392 = vector.load %arg0[%c0_107, %c12_108, %c0_109] : memref<2x16x128xbf16, #tpu.memory_space<vmem>>, vector<1x2x128xbf16>
    %393 = vector.shape_cast %392 : vector<1x2x128xbf16> to vector<2x128xbf16>
    %394 = arith.extf %393 : vector<2x128xbf16> to vector<2x128xf32>
    %395 = arith.truncf %358 : vector<2x32xf32> to vector<2x32xbf16>
    %cst_110 = arith.constant dense<0.000000e+00> : vector<2x128xf32>
    %396 = tpu.matmul %395, %1, %cst_110 {dimension_numbers = #tpu.dot_dimension_numbers<[1], [0], [0], [1], [0, 0, 1, 1], [], []>} : vector<2x32xbf16>, vector<32x128xbf16>, vector<2x128xf32> -> vector<2x128xf32>
    %397 = arith.addf %394, %396 : vector<2x128xf32>
    %398 = vector.extract_strided_slice %397 {offsets = [0, 0], sizes = [2, 32], strides = [1, 1]} : vector<2x128xf32> to vector<2x32xf32>
    %399 = arith.negf %398 : vector<2x32xf32>
    %400 = math.exp %399 : vector<2x32xf32>
    %cst_111 = arith.constant 1.000000e+00 : f32
    %401 = vector.broadcast %cst_111 : f32 to vector<2x32xf32>
    %402 = arith.addf %401, %400 : vector<2x32xf32>
    %403 = arith.divf %401, %402 : vector<2x32xf32>
    %404 = vector.extract_strided_slice %397 {offsets = [0, 32], sizes = [2, 32], strides = [1, 1]} : vector<2x128xf32> to vector<2x32xf32>
    %405 = arith.negf %404 : vector<2x32xf32>
    %406 = math.exp %405 : vector<2x32xf32>
    %cst_112 = arith.constant 1.000000e+00 : f32
    %407 = vector.broadcast %cst_112 : f32 to vector<2x32xf32>
    %408 = arith.addf %407, %406 : vector<2x32xf32>
    %409 = arith.divf %407, %408 : vector<2x32xf32>
    %410 = vector.extract_strided_slice %397 {offsets = [0, 64], sizes = [2, 32], strides = [1, 1]} : vector<2x128xf32> to vector<2x32xf32>
    %411 = math.tanh %410 : vector<2x32xf32>
    %412 = vector.extract_strided_slice %397 {offsets = [0, 96], sizes = [2, 32], strides = [1, 1]} : vector<2x128xf32> to vector<2x32xf32>
    %413 = arith.negf %412 : vector<2x32xf32>
    %414 = math.exp %413 : vector<2x32xf32>
    %cst_113 = arith.constant 1.000000e+00 : f32
    %415 = vector.broadcast %cst_113 : f32 to vector<2x32xf32>
    %416 = arith.addf %415, %414 : vector<2x32xf32>
    %417 = arith.divf %415, %416 : vector<2x32xf32>
    %418 = arith.mulf %409, %356 : vector<2x32xf32>
    %419 = arith.mulf %403, %411 : vector<2x32xf32>
    %420 = arith.addf %418, %419 : vector<2x32xf32>
    %421 = math.tanh %420 : vector<2x32xf32>
    %422 = arith.mulf %417, %421 : vector<2x32xf32>
    %c12_114 = arith.constant 12 : index
    %c0_115 = arith.constant 0 : index
    %423 = vector.load %arg2[%c12_114, %c0_115] : memref<16x64xf32, #tpu.memory_space<vmem>>, vector<2x32xf32>
    tpu.vector_store %arg2[%c12_114, %c0_115], %422 {strides = array<i32>} : memref<16x64xf32, #tpu.memory_space<vmem>>, vector<2x32xf32>,
    %c1_116 = arith.constant 1 : index
    %c2_117 = arith.constant 2 : index
    %c0_118 = arith.constant 0 : index
    %424 = vector.load %arg0[%c1_116, %c2_117, %c0_118] : memref<2x16x128xbf16, #tpu.memory_space<vmem>>, vector<1x2x128xbf16>
    %425 = vector.shape_cast %424 : vector<1x2x128xbf16> to vector<2x128xbf16>
    %426 = arith.extf %425 : vector<2x128xbf16> to vector<2x128xf32>
    %427 = arith.truncf %390 : vector<2x32xf32> to vector<2x32xbf16>
    %cst_119 = arith.constant dense<0.000000e+00> : vector<2x128xf32>
    %428 = tpu.matmul %427, %3, %cst_119 {dimension_numbers = #tpu.dot_dimension_numbers<[1], [0], [0], [1], [0, 0, 1, 1], [], []>} : vector<2x32xbf16>, vector<32x128xbf16>, vector<2x128xf32> -> vector<2x128xf32>
    %429 = arith.addf %426, %428 : vector<2x128xf32>
    %430 = vector.extract_strided_slice %429 {offsets = [0, 0], sizes = [2, 32], strides = [1, 1]} : vector<2x128xf32> to vector<2x32xf32>
    %431 = arith.negf %430 : vector<2x32xf32>
    %432 = math.exp %431 : vector<2x32xf32>
    %cst_120 = arith.constant 1.000000e+00 : f32
    %433 = vector.broadcast %cst_120 : f32 to vector<2x32xf32>
    %434 = arith.addf %433, %432 : vector<2x32xf32>
    %435 = arith.divf %433, %434 : vector<2x32xf32>
    %436 = vector.extract_strided_slice %429 {offsets = [0, 32], sizes = [2, 32], strides = [1, 1]} : vector<2x128xf32> to vector<2x32xf32>
    %437 = arith.negf %436 : vector<2x32xf32>
    %438 = math.exp %437 : vector<2x32xf32>
    %cst_121 = arith.constant 1.000000e+00 : f32
    %439 = vector.broadcast %cst_121 : f32 to vector<2x32xf32>
    %440 = arith.addf %439, %438 : vector<2x32xf32>
    %441 = arith.divf %439, %440 : vector<2x32xf32>
    %442 = vector.extract_strided_slice %429 {offsets = [0, 64], sizes = [2, 32], strides = [1, 1]} : vector<2x128xf32> to vector<2x32xf32>
    %443 = math.tanh %442 : vector<2x32xf32>
    %444 = vector.extract_strided_slice %429 {offsets = [0, 96], sizes = [2, 32], strides = [1, 1]} : vector<2x128xf32> to vector<2x32xf32>
    %445 = arith.negf %444 : vector<2x32xf32>
    %446 = math.exp %445 : vector<2x32xf32>
    %cst_122 = arith.constant 1.000000e+00 : f32
    %447 = vector.broadcast %cst_122 : f32 to vector<2x32xf32>
    %448 = arith.addf %447, %446 : vector<2x32xf32>
    %449 = arith.divf %447, %448 : vector<2x32xf32>
    %450 = arith.mulf %441, %388 : vector<2x32xf32>
    %451 = arith.mulf %435, %443 : vector<2x32xf32>
    %452 = arith.addf %450, %451 : vector<2x32xf32>
    %453 = math.tanh %452 : vector<2x32xf32>
    %454 = arith.mulf %449, %453 : vector<2x32xf32>
    %c2_123 = arith.constant 2 : index
    %c32_124 = arith.constant 32 : index
    %455 = vector.load %arg2[%c2_123, %c32_124] : memref<16x64xf32, #tpu.memory_space<vmem>>, vector<2x32xf32>
    tpu.vector_store %arg2[%c2_123, %c32_124], %454 {strides = array<i32>} : memref<16x64xf32, #tpu.memory_space<vmem>>, vector<2x32xf32>,
    %c0_125 = arith.constant 0 : index
    %c14_126 = arith.constant 14 : index
    %c0_127 = arith.constant 0 : index
    %456 = vector.load %arg0[%c0_125, %c14_126, %c0_127] : memref<2x16x128xbf16, #tpu.memory_space<vmem>>, vector<1x2x128xbf16>
    %457 = vector.shape_cast %456 : vector<1x2x128xbf16> to vector<2x128xbf16>
    %458 = arith.extf %457 : vector<2x128xbf16> to vector<2x128xf32>
    %459 = arith.truncf %422 : vector<2x32xf32> to vector<2x32xbf16>
    %cst_128 = arith.constant dense<0.000000e+00> : vector<2x128xf32>
    %460 = tpu.matmul %459, %1, %cst_128 {dimension_numbers = #tpu.dot_dimension_numbers<[1], [0], [0], [1], [0, 0, 1, 1], [], []>} : vector<2x32xbf16>, vector<32x128xbf16>, vector<2x128xf32> -> vector<2x128xf32>
    %461 = arith.addf %458, %460 : vector<2x128xf32>
    %462 = vector.extract_strided_slice %461 {offsets = [0, 0], sizes = [2, 32], strides = [1, 1]} : vector<2x128xf32> to vector<2x32xf32>
    %463 = arith.negf %462 : vector<2x32xf32>
    %464 = math.exp %463 : vector<2x32xf32>
    %cst_129 = arith.constant 1.000000e+00 : f32
    %465 = vector.broadcast %cst_129 : f32 to vector<2x32xf32>
    %466 = arith.addf %465, %464 : vector<2x32xf32>
    %467 = arith.divf %465, %466 : vector<2x32xf32>
    %468 = vector.extract_strided_slice %461 {offsets = [0, 32], sizes = [2, 32], strides = [1, 1]} : vector<2x128xf32> to vector<2x32xf32>
    %469 = arith.negf %468 : vector<2x32xf32>
    %470 = math.exp %469 : vector<2x32xf32>
    %cst_130 = arith.constant 1.000000e+00 : f32
    %471 = vector.broadcast %cst_130 : f32 to vector<2x32xf32>
    %472 = arith.addf %471, %470 : vector<2x32xf32>
    %473 = arith.divf %471, %472 : vector<2x32xf32>
    %474 = vector.extract_strided_slice %461 {offsets = [0, 64], sizes = [2, 32], strides = [1, 1]} : vector<2x128xf32> to vector<2x32xf32>
    %475 = math.tanh %474 : vector<2x32xf32>
    %476 = vector.extract_strided_slice %461 {offsets = [0, 96], sizes = [2, 32], strides = [1, 1]} : vector<2x128xf32> to vector<2x32xf32>
    %477 = arith.negf %476 : vector<2x32xf32>
    %478 = math.exp %477 : vector<2x32xf32>
    %cst_131 = arith.constant 1.000000e+00 : f32
    %479 = vector.broadcast %cst_131 : f32 to vector<2x32xf32>
    %480 = arith.addf %479, %478 : vector<2x32xf32>
    %481 = arith.divf %479, %480 : vector<2x32xf32>
    %482 = arith.mulf %473, %420 : vector<2x32xf32>
    %483 = arith.mulf %467, %475 : vector<2x32xf32>
    %484 = arith.addf %482, %483 : vector<2x32xf32>
    %485 = math.tanh %484 : vector<2x32xf32>
    %486 = arith.mulf %481, %485 : vector<2x32xf32>
    %c14_132 = arith.constant 14 : index
    %c0_133 = arith.constant 0 : index
    %487 = vector.load %arg2[%c14_132, %c0_133] : memref<16x64xf32, #tpu.memory_space<vmem>>, vector<2x32xf32>
    tpu.vector_store %arg2[%c14_132, %c0_133], %486 {strides = array<i32>} : memref<16x64xf32, #tpu.memory_space<vmem>>, vector<2x32xf32>,
    %c1_134 = arith.constant 1 : index
    %c0_135 = arith.constant 0 : index
    %c0_136 = arith.constant 0 : index
    %488 = vector.load %arg0[%c1_134, %c0_135, %c0_136] : memref<2x16x128xbf16, #tpu.memory_space<vmem>>, vector<1x2x128xbf16>
    %489 = vector.shape_cast %488 : vector<1x2x128xbf16> to vector<2x128xbf16>
    %490 = arith.extf %489 : vector<2x128xbf16> to vector<2x128xf32>
    %491 = arith.truncf %454 : vector<2x32xf32> to vector<2x32xbf16>
    %cst_137 = arith.constant dense<0.000000e+00> : vector<2x128xf32>
    %492 = tpu.matmul %491, %3, %cst_137 {dimension_numbers = #tpu.dot_dimension_numbers<[1], [0], [0], [1], [0, 0, 1, 1], [], []>} : vector<2x32xbf16>, vector<32x128xbf16>, vector<2x128xf32> -> vector<2x128xf32>
    %493 = arith.addf %490, %492 : vector<2x128xf32>
    %494 = vector.extract_strided_slice %493 {offsets = [0, 0], sizes = [2, 32], strides = [1, 1]} : vector<2x128xf32> to vector<2x32xf32>
    %495 = arith.negf %494 : vector<2x32xf32>
    %496 = math.exp %495 : vector<2x32xf32>
    %cst_138 = arith.constant 1.000000e+00 : f32
    %497 = vector.broadcast %cst_138 : f32 to vector<2x32xf32>
    %498 = arith.addf %497, %496 : vector<2x32xf32>
    %499 = arith.divf %497, %498 : vector<2x32xf32>
    %500 = vector.extract_strided_slice %493 {offsets = [0, 32], sizes = [2, 32], strides = [1, 1]} : vector<2x128xf32> to vector<2x32xf32>
    %501 = arith.negf %500 : vector<2x32xf32>
    %502 = math.exp %501 : vector<2x32xf32>
    %cst_139 = arith.constant 1.000000e+00 : f32
    %503 = vector.broadcast %cst_139 : f32 to vector<2x32xf32>
    %504 = arith.addf %503, %502 : vector<2x32xf32>
    %505 = arith.divf %503, %504 : vector<2x32xf32>
    %506 = vector.extract_strided_slice %493 {offsets = [0, 64], sizes = [2, 32], strides = [1, 1]} : vector<2x128xf32> to vector<2x32xf32>
    %507 = math.tanh %506 : vector<2x32xf32>
    %508 = vector.extract_strided_slice %493 {offsets = [0, 96], sizes = [2, 32], strides = [1, 1]} : vector<2x128xf32> to vector<2x32xf32>
    %509 = arith.negf %508 : vector<2x32xf32>
    %510 = math.exp %509 : vector<2x32xf32>
    %cst_140 = arith.constant 1.000000e+00 : f32
    %511 = vector.broadcast %cst_140 : f32 to vector<2x32xf32>
    %512 = arith.addf %511, %510 : vector<2x32xf32>
    %513 = arith.divf %511, %512 : vector<2x32xf32>
    %514 = arith.mulf %505, %452 : vector<2x32xf32>
    %515 = arith.mulf %499, %507 : vector<2x32xf32>
    %516 = arith.addf %514, %515 : vector<2x32xf32>
    %517 = math.tanh %516 : vector<2x32xf32>
    %518 = arith.mulf %513, %517 : vector<2x32xf32>
    %c0_141 = arith.constant 0 : index
    %c32_142 = arith.constant 32 : index
    %519 = vector.load %arg2[%c0_141, %c32_142] : memref<16x64xf32, #tpu.memory_space<vmem>>, vector<2x32xf32>
    tpu.vector_store %arg2[%c0_141, %c32_142], %518 {strides = array<i32>} : memref<16x64xf32, #tpu.memory_space<vmem>>, vector<2x32xf32>,
    return
  }
}

</mosaic_0001>

<bundles_post_ra>
// kernel: recurrent_encoder_forward.2
= control target key start
LH: loop header
LB: loop body
LE: loop exit
PB: predicated region body
PF: predicated region fallthrough
CT: control target
= control target key end

     0   :  { %v1760_v0 = vmov 0.0   ;;  %vm1761_vm0 = vmmov 0   ;;  %v1762_v5 = vmov 0   ;;  %s1763_s20 = smov 64   ;;  %s1764_s21 = smov 32   ;;  %vm35_vm1 = vcmask 261120   ;;  %s2226_s1 = inlined_call_operand.vmem [shape: bf16[2,32,128], index: 1, kind: input, shape index: {}]   ;;  %s2227_s0 = inlined_call_operand.vmem [shape: bf16[2,16,128], index: 0, kind: input, shape index: {}]   ;;  %s2228_s2 = inlined_call_operand.vmem [shape: f32[16,64], index: 2, kind: output, shape index: {}]  }
   0x1   :  { %1495 = vmatprep.subr.bf16.mxu0 %v1760_v0  ;;  %1503 = vmatprep.subr.bf16.mxu1 %v1760_v0  ;;  %v1785_v1 = vld [vmem:[%s2226_s1 + $0x8] sm:$0xff]   ;;  %v1790_v2 = vld [vmem:[%s2226_s1 + $0x18] sm:$0xff]   ;;  %v1800_v3 = vld [vmem:[%s2226_s1] sm:$0xff]   ;;  %vm108_vm2 = vcmask 254976   ;;  %vm197_vm3 = vcmask 523526   ;;  %vm283_vm4 = vcmask 257026  }
   0x2   :  { %1499 = vmatprep.mubr.msk.bf16.mxu0 %vm1761_vm0, %v1760_v0  ;;  %1507 = vmatprep.mubr.msk.bf16.mxu1 %vm1761_vm0, %v1760_v0  ;;  %v1807_v4 = vld [vmem:[%s2226_s1 + $0x10] sm:$0xff]   ;;  %v21_v6 = vld [vmem:[%s2227_s0] sm:$0x1]  ;;  %v1408_v8 = vld [vmem:[%s2227_s0 + $0xc] sm:$0x8]  ;;  %vm370_vm5 = vcmask 521476  }
   0x3   :  { %1496 = vmatpush3.bf16.msra.mxu0 %v1785_v1  ;;  %1504 = vmatpush3.bf16.msra.mxu1 %v1790_v2  ;;  %v22_v7 = vunpack.c.l.bf16 %v21_v6  ;;  %v112_v10 = vunpack.c.l.bf16 %v1408_v8  ;;  %v199_v52 = vld [vmem:[%s2227_s0] sm:$0x2]  ;;  %v1414_v57 = vld [vmem:[%s2227_s0 + $0xc] sm:$0x4]  ;;  %vm457_vm6 = vcmask 259076   ;;  %vm544_vm7 = vcmask 519426  }
   0x4   :  { %1497 = vmatprep.subr.bf16.mxu0 %v1760_v0  ;;  %1505 = vmatprep.subr.bf16.mxu1 %v1760_v0  ;;  %v200_v53 = vunpack.c.l.bf16 %v199_v52  ;;  %v286_v60 = vunpack.c.l.bf16 %v1414_v57  ;;  %vm631_vm8 = vcmask 261126   ;;  %vm715_vm9 = vcmask 517376  }
   0x7   :  { %1498 = vmatpush3.bf16.msra.mxu0 %v1800_v3  ;;  %1506 = vmatpush3.bf16.msra.mxu1 %v1807_v4 }
   0x8   :  { %1511 = vmatprep.subr.bf16.mxu0 %v1760_v0  ;;  %1519 = vmatprep.subr.bf16.mxu1 %v1760_v0 }
   0xa   :  { %1500 = vmatmul.mubr.bf16.vlgmr.msra.gmra.mxu0 %v1762_v5  ;;  %1508 = vmatmul.mubr.bf16.vlgmr.msra.gmra.mxu1 %v1762_v5 }
   0xb   :  { %1512 = vmatpush3.bf16.msra.mxu0 %v1785_v1  ;;  %1520 = vmatpush3.bf16.msra.mxu1 %v1790_v2 }
   0xc   :  { %1513 = vmatprep.subr.bf16.mxu0 %v1760_v0  ;;  %1515 = vmatprep.mubr.msk.bf16.mxu0 %vm1761_vm0, %v1760_v0 }
   0xd   :  { %1521 = vmatprep.subr.bf16.mxu1 %v1760_v0  ;;  %1523 = vmatprep.mubr.msk.bf16.mxu1 %vm1761_vm0, %v1760_v0 }
   0xf   :  { %1514 = vmatpush3.bf16.msra.mxu0 %v1800_v3  ;;  %1522 = vmatpush3.bf16.msra.mxu1 %v1807_v4 }
  0x10   :  { %1527 = vmatprep.subr.bf16.mxu0 %v1760_v0  ;;  %1535 = vmatprep.subr.bf16.mxu1 %v1760_v0 }
  0xca   :  { %v73_v9 = vpop.f32.mrf.mxu0  ;;  %v159_v12 = vpop.f32.mrf.mxu1 }
  0xcb   :  { %v79_v11 = vadd.f32 %v73_v9, %v22_v7  ;;  %v166_v13 = vrot.slane %v159_v12, 2 }
  0xcc   :  { %v1501_v14 = vpop.f32.mrf.mxu0  ;;  %v1509_v15 = vpop.f32.mrf.mxu1 }
  0xcd   :  { %1632 = vtanh.f32 %v79_v11  ;;  %v168_v16 = vadd.f32 %v166_v13, %v112_v10  ;;  %v1407_v23 = vmul.f32 -1.442695, %v79_v11 }
  0xce   :  { %v76_v17 = vpop.f32.mrf.mxu0  ;;  %v162_v18 = vpop.f32.mrf.mxu1 }
  0xcf   :  { %1634 = vtanh.f32 %v168_v16  ;;  %v1411_v24 = vmul.f32 -1.442695, %v168_v16 }
  0xd0   :  { %v1502_v19 = vpop.f32.mrf.mxu0  ;;  %v1510_v20 = vpop.f32.mrf.mxu1  ;;  %1636 = vpow2.f32 %v1407_v23 }
  0xd1   :  { %1638 = vpow2.f32 %v1411_v24 }
  0xda   :  { %v1633_v21 = vpop.eup %1632 }
  0xdb   :  { %89 = vrot.lane.b32.xlu0 %v1633_v21, %s1763_s20 }
  0xdc   :  { %v1635_v22 = vpop.eup %1634 }
  0xdd   :  { %v1637_v25 = vpop.eup %1636 }
  0xde   :  { %v83_v26 = vadd.f32 1.0, %v1637_v25  ;;  %v1639_v27 = vpop.eup %1638 }
  0xdf   :  { %178 = vrot.lane.b32.xlu0 %v1635_v22, %s1763_s20  ;;  %v172_v28 = vadd.f32 1.0, %v1639_v27 }
  0xe0   :  { %1640 = vrcp.f32 %v83_v26 }
  0xe1   :  { %1642 = vrcp.f32 %v172_v28 }
  0xed   :  { %v1641_v29 = vpop.eup %1640 }
  0xee   :  { %v1643_v32 = vpop.eup %1642  ;;  %v87_v35 = vmul.f32 0.0, %v1641_v29 }
  0xef   :  { %v176_v38 = vmul.f32 0.0, %v1643_v32 }
 0x14d   :  { %v90_v30 = vpop.permute.xlu0 %89 }
 0x14e   :  { %v92_v31 = vmul.f32 %v1641_v29, %v90_v30 }
 0x150   :  { %94 = vrot.lane.b32.xlu1 %v92_v31, %s1764_s21 }
 0x151   :  { %v179_v33 = vpop.permute.xlu0 %178 }
 0x152   :  { %v181_v34 = vmul.f32 %v1643_v32, %v179_v33 }
 0x154   :  { %183 = vrot.lane.b32.xlu1 %v181_v34, %s1764_s21 }
 0x1c2   :  { %v95_v36 = vpop.permute.xlu1 %94 }
 0x1c3   :  { %v1836_v37 = vadd.f32 %v95_v36, %v87_v35 }
 0x1c5   :  { %1644 = vtanh.f32 %v1836_v37  ;;  %v260_v23 = vrot.slane %v1836_v37, 6 }
 0x1c6   :  { %v184_v39 = vpop.permute.xlu1 %183 }
 0x1c7   :  { %v1839_v40 = vadd.f32 %v184_v39, %v176_v38 }
 0x1c9   :  { %1646 = vtanh.f32 %v1839_v40  ;;  %v347_v27 = vrot.slane %v1839_v40, 2 }
 0x1d2   :  { %v1645_v41 = vpop.eup %1644 }
 0x1d3   :  { %100 = vrot.lane.b32.xlu0 %v1645_v41, %s1763_s20 }
 0x1d6   :  { %v1647_v42 = vpop.eup %1646 }
 0x1d7   :  { %189 = vrot.lane.b32.xlu1 %v1647_v42, %s1763_s20 }
 0x245   :  { %v101_v43 = vpop.permute.xlu0 %100 }
 0x246   :  { %v1844_v44 = vmul.f32 %v1641_v29, %v101_v43  ;;  %v372_v43 = vld [vmem:[%s2227_s0] sm:$0x4] }
 0x248   :  { %v201_v45 = vpack.c.bf16 %v1844_v44, %v1844_v44 }
 0x249   :  { %v190_v46 = vpop.permute.xlu1 %189 }
 0x24a   :  { %v1848_v47 = vmul.f32 %v1643_v32, %v190_v46  ;;  %203 = vrot.lane.b32.xlu0 %v201_v45, %s1764_s21  ;;  %v373_v45 = vunpack.c.l.bf16 %v372_v43 }
 0x24c   :  { %v287_v48 = vpack.c.bf16 %v1848_v47, %v1848_v47 }
 0x24e   :  { %v289_v49 = vrot.slane %v287_v48, 3 }
 0x250   :  { %290 = vrot.lane.b32.xlu1 %v289_v49, %s1764_s21 }
 0x2bc   :  { %v204_v50 = vpop.permute.xlu0 %203 }
 0x2bd   :  { %1516 = vmatmul.mubr.msk.bf16.vlgmr.msra.gmra.mxu0 %vm35_vm1, %v204_v50  ;;  %v1419_v50 = vld [vmem:[%s2227_s0 + $0xc] sm:$0x2] }
 0x2be   :  { %1528 = vmatpush3.bf16.msra.mxu0 %v1785_v1  ;;  %1531 = vmatprep.mubr.msk.bf16.mxu0 %vm1761_vm0, %v1760_v0 }
 0x2bf   :  { %1529 = vmatprep.subr.bf16.mxu0 %v1760_v0 }
 0x2c2   :  { %v291_v51 = vpop.permute.xlu1 %290  ;;  %1530 = vmatpush3.bf16.msra.mxu0 %v1800_v3 }
 0x2c3   :  { %1524 = vmatmul.mubr.msk.bf16.vlgmr.msra.gmra.mxu1 %vm35_vm1, %v291_v51  ;;  %1543 = vmatprep.subr.bf16.mxu0 %v1760_v0 }
 0x2c4   :  { %1536 = vmatpush3.bf16.msra.mxu1 %v1790_v2  ;;  %1539 = vmatprep.mubr.msk.bf16.mxu1 %vm1761_vm0, %v1760_v0 }
 0x2c5   :  { %1537 = vmatprep.subr.bf16.mxu1 %v1760_v0 }
 0x2c8   :  { %1538 = vmatpush3.bf16.msra.mxu1 %v1807_v4 }
 0x2c9   :  { %1551 = vmatprep.subr.bf16.mxu1 %v1760_v0 }
 0x37d   :  { %v242_v54 = vpop.f32.mrf.mxu0 }
 0x37e   :  { %v249_v55 = vrot.slane %v242_v54, 6 }
 0x37f   :  { %v1517_v56 = vpop.f32.mrf.mxu0 }
 0x380   :  { %v251_v58 = vadd.f32 %v249_v55, %v200_v53  ;;  %v460_v53 = vunpack.c.l.bf16 %v1419_v50 }
 0x381   :  { %v245_v59 = vpop.f32.mrf.mxu0 }
 0x382   :  { %1648 = vtanh.f32 %v251_v58  ;;  %v1413_v11 = vmul.f32 -1.442695, %v251_v58 }
 0x383   :  { %v1518_v61 = vpop.f32.mrf.mxu0  ;;  %v329_v62 = vpop.f32.mrf.mxu1 }
 0x384   :  { %v336_v63 = vrot.slane %v329_v62, 4 }
 0x385   :  { %v1525_v5 = vpop.f32.mrf.mxu1 }
 0x386   :  { %v338_v6 = vadd.f32 %v336_v63, %v286_v60 }
 0x387   :  { %v332_v7 = vpop.f32.mrf.mxu1 }
 0x388   :  { %1650 = vtanh.f32 %v338_v6  ;;  %v1416_v12 = vmul.f32 -1.442695, %v338_v6 }
 0x389   :  { %v1526_v8 = vpop.f32.mrf.mxu1  ;;  %1652 = vpow2.f32 %v1413_v11 }
 0x38a   :  { %1654 = vpow2.f32 %v1416_v12 }
 0x38f   :  { %v1649_v9 = vpop.eup %1648 }
 0x390   :  { %264 = vrot.lane.b32.xlu0 %v1649_v9, %s1763_s20 }
 0x395   :  { %v1651_v10 = vpop.eup %1650 }
 0x396   :  { %351 = vrot.lane.b32.xlu1 %v1651_v10, %s1763_s20  ;;  %v1653_v13 = vpop.eup %1652 }
 0x397   :  { %v255_v14 = vadd.f32 1.0, %v1653_v13  ;;  %v1655_v15 = vpop.eup %1654 }
 0x398   :  { %v342_v16 = vadd.f32 1.0, %v1655_v15 }
 0x399   :  { %1656 = vrcp.f32 %v255_v14 }
 0x39a   :  { %1658 = vrcp.f32 %v342_v16 }
 0x3a6   :  { %v1657_v17 = vpop.eup %1656 }
 0x3a7   :  { %v1659_v20 = vpop.eup %1658  ;;  %v262_v24 = vmul.f32 %v1657_v17, %v260_v23 }
 0x3a8   :  { %v349_v28 = vmul.f32 %v1659_v20, %v347_v27 }
 0x402   :  { %v265_v18 = vpop.permute.xlu0 %264 }
 0x403   :  { %v267_v19 = vmul.f32 %v1657_v17, %v265_v18 }
 0x405   :  { %269 = vrot.lane.b32.xlu0 %v267_v19, %s1764_s21 }
 0x408   :  { %v352_v21 = vpop.permute.xlu1 %351 }
 0x409   :  { %v354_v22 = vmul.f32 %v1659_v20, %v352_v21 }
 0x40b   :  { %356 = vrot.lane.b32.xlu1 %v354_v22, %s1764_s21 }
 0x477   :  { %v270_v25 = vpop.permute.xlu0 %269 }
 0x478   :  { %v1879_v26 = vadd.f32 %v270_v25, %v262_v24 }
 0x47a   :  { %1660 = vtanh.f32 %v1879_v26  ;;  %v434_v16 = vrot.slane %v1879_v26, 6 }
 0x47d   :  { %v357_v29 = vpop.permute.xlu1 %356 }
 0x47e   :  { %v1883_v30 = vadd.f32 %v357_v29, %v349_v28 }
 0x480   :  { %1662 = vtanh.f32 %v1883_v30 }
 0x487   :  { %v1661_v31 = vpop.eup %1660 }
 0x488   :  { %275 = vrot.lane.b32.xlu0 %v1661_v31, %s1763_s20 }
 0x48d   :  { %v1663_v32 = vpop.eup %1662 }
 0x48e   :  { %362 = vrot.lane.b32.xlu1 %v1663_v32, %s1763_s20 }
 0x4fa   :  { %v276_v33 = vpop.permute.xlu0 %275 }
 0x4fb   :  { %v1888_v34 = vmul.f32 %v1657_v17, %v276_v33 }
 0x4fd   :  { %v374_v35 = vpack.c.bf16 %v1888_v34, %v1888_v34 }
 0x4ff   :  { %v376_v36 = vrot.slane %v374_v35, 1 }
 0x500   :  { %v363_v37 = vpop.permute.xlu1 %362 }
 0x501   :  { %v1892_v38 = vmul.f32 %v1659_v20, %v363_v37  ;;  %377 = vrot.lane.b32.xlu0 %v376_v36, %s1764_s21  ;;  %v521_v20 = vrot.slane %v1883_v30, 2  ;;  %v546_v37 = vld [vmem:[%s2227_s0] sm:$0x8] }
 0x503   :  { %v461_v39 = vpack.c.bf16 %v1892_v38, %v1892_v38 }
 0x505   :  { %v463_v40 = vrot.slane %v461_v39, 2  ;;  %v547_v39 = vunpack.c.l.bf16 %v546_v37 }
 0x507   :  { %464 = vrot.lane.b32.xlu1 %v463_v40, %s1764_s21 }
 0x573   :  { %v378_v41 = vpop.permute.xlu0 %377 }
 0x574   :  { %1532 = vmatmul.mubr.msk.bf16.vlgmr.msra.gmra.mxu0 %vm35_vm1, %v378_v41  ;;  %v1424_v41 = vld [vmem:[%s2227_s0 + $0xc] sm:$0x1] }
 0x575   :  { %1544 = vmatpush3.bf16.msra.mxu0 %v1785_v1  ;;  %1547 = vmatprep.mubr.msk.bf16.mxu0 %vm1761_vm0, %v1760_v0 }
 0x576   :  { %1545 = vmatprep.subr.bf16.mxu0 %v1760_v0 }
 0x579   :  { %v465_v42 = vpop.permute.xlu1 %464  ;;  %1546 = vmatpush3.bf16.msra.mxu0 %v1800_v3 }
 0x57a   :  { %1540 = vmatmul.mubr.msk.bf16.vlgmr.msra.gmra.mxu1 %vm35_vm1, %v465_v42  ;;  %1559 = vmatprep.subr.bf16.mxu0 %v1760_v0 }
 0x57b   :  { %1552 = vmatpush3.bf16.msra.mxu1 %v1790_v2  ;;  %1555 = vmatprep.mubr.msk.bf16.mxu1 %vm1761_vm0, %v1760_v0 }
 0x57c   :  { %1553 = vmatprep.subr.bf16.mxu1 %v1760_v0 }
 0x57f   :  { %1554 = vmatpush3.bf16.msra.mxu1 %v1807_v4 }
 0x580   :  { %1567 = vmatprep.subr.bf16.mxu1 %v1760_v0 }
 0x634   :  { %v416_v46 = vpop.f32.mrf.mxu0 }
 0x635   :  { %v423_v48 = vrot.slane %v416_v46, 4  ;;  %v634_v46 = vunpack.c.l.bf16 %v1424_v41 }
 0x636   :  { %v1533_v49 = vpop.f32.mrf.mxu0 }
 0x637   :  { %v425_v51 = vadd.f32 %v423_v48, %v373_v45 }
 0x638   :  { %v419_v52 = vpop.f32.mrf.mxu0 }
 0x639   :  { %1664 = vtanh.f32 %v425_v51  ;;  %v1418_v63 = vmul.f32 -1.442695, %v425_v51 }
 0x63a   :  { %v1534_v54 = vpop.f32.mrf.mxu0  ;;  %v503_v55 = vpop.f32.mrf.mxu1 }
 0x63b   :  { %v510_v56 = vrot.slane %v503_v55, 6 }
 0x63c   :  { %v1541_v57 = vpop.f32.mrf.mxu1 }
 0x63d   :  { %v512_v58 = vadd.f32 %v510_v56, %v460_v53 }
 0x63e   :  { %v506_v59 = vpop.f32.mrf.mxu1 }
 0x63f   :  { %1666 = vtanh.f32 %v512_v58  ;;  %v1421_v5 = vmul.f32 -1.442695, %v512_v58 }
 0x640   :  { %v1542_v60 = vpop.f32.mrf.mxu1  ;;  %1668 = vpow2.f32 %v1418_v63 }
 0x641   :  { %1670 = vpow2.f32 %v1421_v5 }
 0x646   :  { %v1665_v61 = vpop.eup %1664 }
 0x647   :  { %438 = vrot.lane.b32.xlu0 %v1665_v61, %s1763_s20 }
 0x64c   :  { %v1667_v62 = vpop.eup %1666 }
 0x64d   :  { %525 = vrot.lane.b32.xlu1 %v1667_v62, %s1763_s20  ;;  %v1669_v6 = vpop.eup %1668 }
 0x64e   :  { %v429_v7 = vadd.f32 1.0, %v1669_v6  ;;  %v1671_v8 = vpop.eup %1670 }
 0x64f   :  { %v516_v9 = vadd.f32 1.0, %v1671_v8 }
 0x650   :  { %1672 = vrcp.f32 %v429_v7 }
 0x651   :  { %1674 = vrcp.f32 %v516_v9 }
 0x65d   :  { %v1673_v10 = vpop.eup %1672 }
 0x65e   :  { %v1675_v13 = vpop.eup %1674  ;;  %v436_v17 = vmul.f32 %v1673_v10, %v434_v16 }
 0x65f   :  { %v523_v21 = vmul.f32 %v1675_v13, %v521_v20 }
 0x6b9   :  { %v439_v11 = vpop.permute.xlu0 %438 }
 0x6ba   :  { %v441_v12 = vmul.f32 %v1673_v10, %v439_v11 }
 0x6bc   :  { %443 = vrot.lane.b32.xlu0 %v441_v12, %s1764_s21 }
 0x6bf   :  { %v526_v14 = vpop.permute.xlu1 %525 }
 0x6c0   :  { %v528_v15 = vmul.f32 %v1675_v13, %v526_v14 }
 0x6c2   :  { %530 = vrot.lane.b32.xlu1 %v528_v15, %s1764_s21 }
 0x72e   :  { %v444_v18 = vpop.permute.xlu0 %443 }
 0x72f   :  { %v1923_v19 = vadd.f32 %v444_v18, %v436_v17 }
 0x731   :  { %1676 = vtanh.f32 %v1923_v19 }
 0x734   :  { %v531_v22 = vpop.permute.xlu1 %530 }
 0x735   :  { %v1927_v23 = vadd.f32 %v531_v22, %v523_v21 }
 0x737   :  { %1678 = vtanh.f32 %v1927_v23 }
 0x73e   :  { %v1677_v24 = vpop.eup %1676 }
 0x73f   :  { %449 = vrot.lane.b32.xlu0 %v1677_v24, %s1763_s20 }
 0x744   :  { %v1679_v25 = vpop.eup %1678 }
 0x745   :  { %536 = vrot.lane.b32.xlu1 %v1679_v25, %s1763_s20 }
 0x7b1   :  { %v450_v26 = vpop.permute.xlu0 %449 }
 0x7b2   :  { %v1932_v27 = vmul.f32 %v1673_v10, %v450_v26  ;;  %v608_v10 = vrot.slane %v1923_v19, 6 }
 0x7b4   :  { %v548_v28 = vpack.c.bf16 %v1932_v27, %v1932_v27 }
 0x7b6   :  { %v550_v29 = vrot.slane %v548_v28, 2 }
 0x7b7   :  { %v537_v30 = vpop.permute.xlu1 %536 }
 0x7b8   :  { %v1936_v31 = vmul.f32 %v1675_v13, %v537_v30  ;;  %551 = vrot.lane.b32.xlu0 %v550_v29, %s1764_s21  ;;  %v692_v13 = vrot.slane %v1927_v23, 2  ;;  %v717_v30 = vld [vmem:[%s2227_s0 + $0x4] sm:$0x1] }
 0x7ba   :  { %v635_v32 = vpack.c.bf16 %v1936_v31, %v1936_v31 }
 0x7bc   :  { %v637_v33 = vrot.slane %v635_v32, 1  ;;  %v718_v32 = vunpack.c.l.bf16 %v717_v30 }
 0x7be   :  { %638 = vrot.lane.b32.xlu1 %v637_v33, %s1764_s21  ;;  %v1429_v33 = vld [vmem:[%s2227_s0 + $0x8] sm:$0x8] }
 0x7bf   :  { %v801_v37 = vunpack.c.l.bf16 %v1429_v33  ;;  %v1434_v33 = vld [vmem:[%s2227_s0 + $0x8] sm:$0x4] }
 0x82a   :  { %v552_v35 = vpop.permute.xlu0 %551 }
 0x82b   :  { %1548 = vmatmul.mubr.msk.bf16.vlgmr.msra.gmra.mxu0 %vm35_vm1, %v552_v35 }
 0x82c   :  { %1560 = vmatpush3.bf16.msra.mxu0 %v1785_v1  ;;  %1563 = vmatprep.mubr.msk.bf16.mxu0 %vm1761_vm0, %v1760_v0 }
 0x82d   :  { %1561 = vmatprep.subr.bf16.mxu0 %v1760_v0 }
 0x830   :  { %v639_v36 = vpop.permute.xlu1 %638  ;;  %1562 = vmatpush3.bf16.msra.mxu0 %v1800_v3 }
 0x831   :  { %1556 = vmatmul.mubr.msk.bf16.vlgmr.msra.gmra.mxu1 %vm35_vm1, %v639_v36  ;;  %1575 = vmatprep.subr.bf16.mxu0 %v1760_v0 }
 0x832   :  { %1568 = vmatpush3.bf16.msra.mxu1 %v1790_v2  ;;  %1571 = vmatprep.mubr.msk.bf16.mxu1 %vm1761_vm0, %v1760_v0 }
 0x833   :  { %1569 = vmatprep.subr.bf16.mxu1 %v1760_v0 }
 0x836   :  { %1570 = vmatpush3.bf16.msra.mxu1 %v1807_v4 }
 0x837   :  { %1583 = vmatprep.subr.bf16.mxu1 %v1760_v0 }
 0x8eb   :  { %v590_v40 = vpop.f32.mrf.mxu0 }
 0x8ec   :  { %v597_v42 = vrot.slane %v590_v40, 2 }
 0x8ed   :  { %v1549_v43 = vpop.f32.mrf.mxu0 }
 0x8ee   :  { %v599_v45 = vadd.f32 %v597_v42, %v547_v39 }
 0x8ef   :  { %v593_v48 = vpop.f32.mrf.mxu0 }
 0x8f0   :  { %1680 = vtanh.f32 %v599_v45  ;;  %v1423_v57 = vmul.f32 -1.442695, %v599_v45 }
 0x8f1   :  { %v1550_v49 = vpop.f32.mrf.mxu0  ;;  %v677_v50 = vpop.f32.mrf.mxu1 }
 0x8f2   :  { %v683_v51 = vadd.f32 %v677_v50, %v634_v46 }
 0x8f3   :  { %v1557_v52 = vpop.f32.mrf.mxu1 }
 0x8f4   :  { %1682 = vtanh.f32 %v683_v51  ;;  %v1426_v58 = vmul.f32 -1.442695, %v683_v51 }
 0x8f5   :  { %v680_v53 = vpop.f32.mrf.mxu1  ;;  %1684 = vpow2.f32 %v1423_v57 }
 0x8f6   :  { %1686 = vpow2.f32 %v1426_v58 }
 0x8f7   :  { %v1558_v54 = vpop.f32.mrf.mxu1 }
 0x8fd   :  { %v1681_v55 = vpop.eup %1680 }
 0x8fe   :  { %612 = vrot.lane.b32.xlu0 %v1681_v55, %s1763_s20 }
 0x901   :  { %v1683_v56 = vpop.eup %1682 }
 0x902   :  { %696 = vrot.lane.b32.xlu1 %v1683_v56, %s1763_s20  ;;  %v1685_v59 = vpop.eup %1684 }
 0x903   :  { %v603_v60 = vadd.f32 1.0, %v1685_v59  ;;  %v1687_v61 = vpop.eup %1686 }
 0x904   :  { %v687_v62 = vadd.f32 1.0, %v1687_v61 }
 0x905   :  { %1688 = vrcp.f32 %v603_v60 }
 0x906   :  { %1690 = vrcp.f32 %v687_v62 }
 0x912   :  { %v1689_v63 = vpop.eup %1688 }
 0x913   :  { %v1691_v7 = vpop.eup %1690  ;;  %v610_v11 = vmul.f32 %v1689_v63, %v608_v10 }
 0x914   :  { %v694_v15 = vmul.f32 %v1691_v7, %v692_v13 }
 0x970   :  { %v613_v5 = vpop.permute.xlu0 %612 }
 0x971   :  { %v615_v6 = vmul.f32 %v1689_v63, %v613_v5 }
 0x973   :  { %617 = vrot.lane.b32.xlu0 %v615_v6, %s1764_s21 }
 0x974   :  { %v697_v8 = vpop.permute.xlu1 %696 }
 0x975   :  { %v699_v9 = vmul.f32 %v1691_v7, %v697_v8 }
 0x977   :  { %701 = vrot.lane.b32.xlu1 %v699_v9, %s1764_s21 }
 0x9e5   :  { %v618_v12 = vpop.permute.xlu0 %617 }
 0x9e6   :  { %v1968_v14 = vadd.f32 %v618_v12, %v610_v11 }
 0x9e8   :  { %1692 = vtanh.f32 %v1968_v14  ;;  %v776_v5 = vrot.slane %v1968_v14, 6 }
 0x9e9   :  { %v702_v16 = vpop.permute.xlu1 %701 }
 0x9ea   :  { %v1971_v17 = vadd.f32 %v702_v16, %v694_v15 }
 0x9ec   :  { %1694 = vtanh.f32 %v1971_v17  ;;  %v861_v8 = vrot.slane %v1971_v17, 2 }
 0x9f5   :  { %v1693_v18 = vpop.eup %1692 }
 0x9f6   :  { %623 = vrot.lane.b32.xlu0 %v1693_v18, %s1763_s20 }
 0x9f9   :  { %v1695_v20 = vpop.eup %1694 }
 0x9fa   :  { %707 = vrot.lane.b32.xlu1 %v1695_v20, %s1763_s20 }
 0xa68   :  { %v624_v19 = vpop.permute.xlu0 %623 }
 0xa69   :  { %v1976_v21 = vmul.f32 %v1689_v63, %v624_v19 }
 0xa6b   :  { %v719_v22 = vpack.c.bf16 %v1976_v21, %v1976_v21 }
 0xa6c   :  { %v708_v23 = vpop.permute.xlu1 %707 }
 0xa6d   :  { %v721_v24 = vrot.slane %v719_v22, 3  ;;  %v1980_v25 = vmul.f32 %v1691_v7, %v708_v23 }
 0xa6f   :  { %v802_v26 = vpack.c.bf16 %v1980_v25, %v1980_v25  ;;  %722 = vrot.lane.b32.xlu1 %v721_v24, %s1764_s21 }
 0xa71   :  { %804 = vrot.lane.b32.xlu0 %v802_v26, %s1764_s21  ;;  %v885_v26 = vld [vmem:[%s2227_s0 + $0x4] sm:$0x2] }
 0xae1   :  { %v723_v28 = vpop.permute.xlu1 %722 }
 0xae2   :  { %1564 = vmatmul.mubr.msk.bf16.vlgmr.msra.gmra.mxu0 %vm35_vm1, %v723_v28  ;;  %v886_v28 = vunpack.c.l.bf16 %v885_v26 }
 0xae3   :  { %v805_v29 = vpop.permute.xlu0 %804  ;;  %1576 = vmatpush3.bf16.msra.mxu0 %v1785_v1  ;;  %1579 = vmatprep.mubr.msk.bf16.mxu0 %vm1761_vm0, %v1760_v0 }
 0xae4   :  { %1572 = vmatmul.mubr.msk.bf16.vlgmr.msra.gmra.mxu1 %vm35_vm1, %v805_v29  ;;  %1577 = vmatprep.subr.bf16.mxu0 %v1760_v0 }
 0xae5   :  { %1584 = vmatpush3.bf16.msra.mxu1 %v1790_v2  ;;  %1587 = vmatprep.mubr.msk.bf16.mxu1 %vm1761_vm0, %v1760_v0 }
 0xae6   :  { %1585 = vmatprep.subr.bf16.mxu1 %v1760_v0 }
 0xae7   :  { %1578 = vmatpush3.bf16.msra.mxu0 %v1800_v3 }
 0xae8   :  { %1591 = vmatprep.subr.bf16.mxu0 %v1760_v0 }
 0xae9   :  { %1586 = vmatpush3.bf16.msra.mxu1 %v1807_v4 }
 0xaea   :  { %1599 = vmatprep.subr.bf16.mxu1 %v1760_v0 }
 0xba2   :  { %v761_v35 = vpop.f32.mrf.mxu0 }
 0xba3   :  { %v767_v36 = vadd.f32 %v761_v35, %v718_v32 }
 0xba4   :  { %v1565_v39 = vpop.f32.mrf.mxu0  ;;  %v843_v40 = vpop.f32.mrf.mxu1 }
 0xba5   :  { %1696 = vtanh.f32 %v767_v36  ;;  %v850_v41 = vrot.slane %v843_v40, 2  ;;  %v1428_v52 = vmul.f32 -1.442695, %v767_v36 }
 0xba6   :  { %v764_v42 = vpop.f32.mrf.mxu0  ;;  %v1573_v43 = vpop.f32.mrf.mxu1 }
 0xba7   :  { %v852_v45 = vadd.f32 %v850_v41, %v801_v37  ;;  %v971_v37 = vunpack.c.l.bf16 %v1434_v33 }
 0xba8   :  { %v1566_v46 = vpop.f32.mrf.mxu0  ;;  %v846_v48 = vpop.f32.mrf.mxu1 }
 0xba9   :  { %1698 = vtanh.f32 %v852_v45  ;;  %v1431_v53 = vmul.f32 -1.442695, %v852_v45 }
 0xbaa   :  { %v1574_v49 = vpop.f32.mrf.mxu1  ;;  %1700 = vpow2.f32 %v1428_v52 }
 0xbab   :  { %1702 = vpow2.f32 %v1431_v53 }
 0xbb2   :  { %v1697_v50 = vpop.eup %1696 }
 0xbb3   :  { %780 = vrot.lane.b32.xlu0 %v1697_v50, %s1763_s20 }
 0xbb6   :  { %v1699_v51 = vpop.eup %1698 }
 0xbb7   :  { %865 = vrot.lane.b32.xlu1 %v1699_v51, %s1763_s20  ;;  %v1701_v54 = vpop.eup %1700 }
 0xbb8   :  { %v771_v55 = vadd.f32 1.0, %v1701_v54  ;;  %v1703_v56 = vpop.eup %1702 }
 0xbb9   :  { %v856_v57 = vadd.f32 1.0, %v1703_v56 }
 0xbba   :  { %1704 = vrcp.f32 %v771_v55 }
 0xbbb   :  { %1706 = vrcp.f32 %v856_v57 }
 0xbc7   :  { %v1705_v58 = vpop.eup %1704 }
 0xbc8   :  { %v1707_v61 = vpop.eup %1706  ;;  %v778_v6 = vmul.f32 %v1705_v58, %v776_v5 }
 0xbc9   :  { %v863_v10 = vmul.f32 %v1707_v61, %v861_v8 }
 0xc25   :  { %v781_v59 = vpop.permute.xlu0 %780 }
 0xc26   :  { %v783_v60 = vmul.f32 %v1705_v58, %v781_v59 }
 0xc28   :  { %785 = vrot.lane.b32.xlu0 %v783_v60, %s1764_s21 }
 0xc29   :  { %v866_v62 = vpop.permute.xlu1 %865 }
 0xc2a   :  { %v868_v63 = vmul.f32 %v1707_v61, %v866_v62 }
 0xc2c   :  { %870 = vrot.lane.b32.xlu1 %v868_v63, %s1764_s21 }
 0xc9a   :  { %v786_v7 = vpop.permute.xlu0 %785 }
 0xc9b   :  { %v2012_v9 = vadd.f32 %v786_v7, %v778_v6 }
 0xc9d   :  { %1708 = vtanh.f32 %v2012_v9  ;;  %v946_v62 = vrot.slane %v2012_v9, 6 }
 0xc9e   :  { %v871_v11 = vpop.permute.xlu1 %870 }
 0xc9f   :  { %v2015_v12 = vadd.f32 %v871_v11, %v863_v10 }
 0xca1   :  { %1710 = vtanh.f32 %v2015_v12  ;;  %v1032_v7 = vrot.slane %v2015_v12, 2 }
 0xcaa   :  { %v1709_v13 = vpop.eup %1708 }
 0xcab   :  { %791 = vrot.lane.b32.xlu0 %v1709_v13, %s1763_s20 }
 0xcae   :  { %v1711_v15 = vpop.eup %1710 }
 0xcaf   :  { %876 = vrot.lane.b32.xlu1 %v1711_v15, %s1763_s20 }
 0xd1d   :  { %v792_v14 = vpop.permute.xlu0 %791 }
 0xd1e   :  { %v2020_v16 = vmul.f32 %v1705_v58, %v792_v14 }
 0xd20   :  { %v887_v17 = vpack.c.bf16 %v2020_v16, %v2020_v16 }
 0xd21   :  { %v877_v18 = vpop.permute.xlu1 %876 }
 0xd22   :  { %v2024_v20 = vmul.f32 %v1707_v61, %v877_v18  ;;  %889 = vrot.lane.b32.xlu0 %v887_v17, %s1764_s21 }
 0xd24   :  { %v972_v19 = vpack.c.bf16 %v2024_v20, %v2024_v20 }
 0xd26   :  { %v974_v22 = vrot.slane %v972_v19, 3 }
 0xd28   :  { %975 = vrot.lane.b32.xlu1 %v974_v22, %s1764_s21 }
 0xd94   :  { %v890_v23 = vpop.permute.xlu0 %889 }
 0xd95   :  { %1580 = vmatmul.mubr.msk.bf16.vlgmr.msra.gmra.mxu0 %vm35_vm1, %v890_v23 }
 0xd96   :  { %1592 = vmatpush3.bf16.msra.mxu0 %v1785_v1  ;;  %1595 = vmatprep.mubr.msk.bf16.mxu0 %vm1761_vm0, %v1760_v0 }
 0xd97   :  { %1593 = vmatprep.subr.bf16.mxu0 %v1760_v0 }
 0xd9a   :  { %v976_v24 = vpop.permute.xlu1 %975  ;;  %1594 = vmatpush3.bf16.msra.mxu0 %v1800_v3 }
 0xd9b   :  { %1588 = vmatmul.mubr.msk.bf16.vlgmr.msra.gmra.mxu1 %vm35_vm1, %v976_v24  ;;  %1607 = vmatprep.subr.bf16.mxu0 %v1760_v0 }
 0xd9c   :  { %1600 = vmatpush3.bf16.msra.mxu1 %v1790_v2  ;;  %1603 = vmatprep.mubr.msk.bf16.mxu1 %vm1761_vm0, %v1760_v0 }
 0xd9d   :  { %1601 = vmatprep.subr.bf16.mxu1 %v1760_v0 }
 0xda0   :  { %1602 = vmatpush3.bf16.msra.mxu1 %v1807_v4 }
 0xda1   :  { %1615 = vmatprep.subr.bf16.mxu1 %v1760_v0 }
 0xe55   :  { %v928_v29 = vpop.f32.mrf.mxu0 }
 0xe56   :  { %v935_v30 = vrot.slane %v928_v29, 6 }
 0xe57   :  { %v1581_v32 = vpop.f32.mrf.mxu0 }
 0xe58   :  { %v937_v35 = vadd.f32 %v935_v30, %v886_v28 }
 0xe59   :  { %v931_v36 = vpop.f32.mrf.mxu0 }
 0xe5a   :  { %1712 = vtanh.f32 %v937_v35  ;;  %v1433_v50 = vmul.f32 -1.442695, %v937_v35 }
 0xe5b   :  { %v1582_v39 = vpop.f32.mrf.mxu0  ;;  %v1014_v40 = vpop.f32.mrf.mxu1 }
 0xe5c   :  { %v1021_v41 = vrot.slane %v1014_v40, 4 }
 0xe5d   :  { %v1589_v42 = vpop.f32.mrf.mxu1 }
 0xe5e   :  { %v1023_v43 = vadd.f32 %v1021_v41, %v971_v37 }
 0xe5f   :  { %v1017_v45 = vpop.f32.mrf.mxu1 }
 0xe60   :  { %1714 = vtanh.f32 %v1023_v43  ;;  %v1436_v51 = vmul.f32 -1.442695, %v1023_v43 }
 0xe61   :  { %v1590_v46 = vpop.f32.mrf.mxu1  ;;  %1716 = vpow2.f32 %v1433_v50 }
 0xe62   :  { %1718 = vpow2.f32 %v1436_v51 }
 0xe67   :  { %v1713_v48 = vpop.eup %1712 }
 0xe68   :  { %950 = vrot.lane.b32.xlu0 %v1713_v48, %s1763_s20 }
 0xe6d   :  { %v1715_v49 = vpop.eup %1714 }
 0xe6e   :  { %1036 = vrot.lane.b32.xlu1 %v1715_v49, %s1763_s20  ;;  %v1717_v52 = vpop.eup %1716 }
 0xe6f   :  { %v941_v53 = vadd.f32 1.0, %v1717_v52  ;;  %v1719_v54 = vpop.eup %1718 }
 0xe70   :  { %v1027_v55 = vadd.f32 1.0, %v1719_v54 }
 0xe71   :  { %1720 = vrcp.f32 %v941_v53 }
 0xe72   :  { %1722 = vrcp.f32 %v1027_v55 }
 0xe7e   :  { %v1721_v56 = vpop.eup %1720 }
 0xe7f   :  { %v1723_v59 = vpop.eup %1722  ;;  %v948_v63 = vmul.f32 %v1721_v56, %v946_v62 }
 0xe80   :  { %v1034_v8 = vmul.f32 %v1723_v59, %v1032_v7 }
 0xeda   :  { %v951_v57 = vpop.permute.xlu0 %950 }
 0xedb   :  { %v953_v58 = vmul.f32 %v1721_v56, %v951_v57 }
 0xedd   :  { %955 = vrot.lane.b32.xlu0 %v953_v58, %s1764_s21 }
 0xee0   :  { %v1037_v60 = vpop.permute.xlu1 %1036 }
 0xee1   :  { %v1039_v61 = vmul.f32 %v1723_v59, %v1037_v60 }
 0xee3   :  { %1041 = vrot.lane.b32.xlu1 %v1039_v61, %s1764_s21 }
 0xf4f   :  { %v956_v5 = vpop.permute.xlu0 %955 }
 0xf50   :  { %v2055_v6 = vadd.f32 %v956_v5, %v948_v63 }
 0xf52   :  { %1724 = vtanh.f32 %v2055_v6  ;;  %v1118_v58 = vrot.slane %v2055_v6, 6 }
 0xf55   :  { %v1042_v10 = vpop.permute.xlu1 %1041 }
 0xf56   :  { %v2059_v11 = vadd.f32 %v1042_v10, %v1034_v8 }
 0xf58   :  { %1726 = vtanh.f32 %v2059_v11  ;;  %v1204_v62 = vrot.slane %v2059_v11, 2 }
 0xf5f   :  { %v1725_v13 = vpop.eup %1724 }
 0xf60   :  { %961 = vrot.lane.b32.xlu0 %v1725_v13, %s1763_s20 }
 0xf65   :  { %v1727_v15 = vpop.eup %1726 }
 0xf66   :  { %1047 = vrot.lane.b32.xlu1 %v1727_v15, %s1763_s20 }
 0xfd2   :  { %v962_v9 = vpop.permute.xlu0 %961 }
 0xfd3   :  { %v2064_v14 = vmul.f32 %v1721_v56, %v962_v9 }
 0xfd5   :  { %v1058_v12 = vpack.c.bf16 %v2064_v14, %v2064_v14 }
 0xfd7   :  { %v1060_v17 = vrot.slane %v1058_v12, 1 }
 0xfd8   :  { %v1048_v18 = vpop.permute.xlu1 %1047 }
 0xfd9   :  { %v2068_v19 = vmul.f32 %v1723_v59, %v1048_v18  ;;  %1061 = vrot.lane.b32.xlu0 %v1060_v17, %s1764_s21 }
 0xfdb   :  { %v1144_v22 = vpack.c.bf16 %v2068_v19, %v2068_v19 }
 0xfdd   :  { %v1146_v23 = vrot.slane %v1144_v22, 2 }
 0xfdf   :  { %1147 = vrot.lane.b32.xlu1 %v1146_v23, %s1764_s21 }
0x104b   :  { %v1062_v24 = vpop.permute.xlu0 %1061 }
0x104c   :  { %1596 = vmatmul.mubr.msk.bf16.vlgmr.msra.gmra.mxu0 %vm35_vm1, %v1062_v24  ;;  %v1228_v24 = vld [vmem:[%s2227_s0 + $0x4] sm:$0x8] }
0x104d   :  { %1608 = vmatpush3.bf16.msra.mxu0 %v1785_v1  ;;  %1611 = vmatprep.mubr.msk.bf16.mxu0 %vm1761_vm0, %v1760_v0  ;;  %v1056_v1 = vld [vmem:[%s2227_s0 + $0x4] sm:$0x4] }
0x104e   :  { %1609 = vmatprep.subr.bf16.mxu0 %v1760_v0  ;;  %v1057_v28 = vunpack.c.l.bf16 %v1056_v1 }
0x1051   :  { %v1148_v26 = vpop.permute.xlu1 %1147  ;;  %1610 = vmatpush3.bf16.msra.mxu0 %v1800_v3  ;;  %v1439_v3 = vld [vmem:[%s2227_s0 + $0x8] sm:$0x2] }
0x1052   :  { %1604 = vmatmul.mubr.msk.bf16.vlgmr.msra.gmra.mxu1 %vm35_vm1, %v1148_v26  ;;  %v1143_v35 = vunpack.c.l.bf16 %v1439_v3  ;;  %v1229_v26 = vunpack.c.l.bf16 %v1228_v24 }
0x1053   :  { %1616 = vmatpush3.bf16.msra.mxu1 %v1790_v2  ;;  %1619 = vmatprep.mubr.msk.bf16.mxu1 %vm1761_vm0, %v1760_v0 }
0x1054   :  { %1617 = vmatprep.subr.bf16.mxu1 %v1760_v0 }
0x1057   :  { %1618 = vmatpush3.bf16.msra.mxu1 %v1807_v4 }
0x110c   :  { %v1100_v29 = vpop.f32.mrf.mxu0 }
0x110d   :  { %v1107_v30 = vrot.slane %v1100_v29, 4 }
0x110e   :  { %v1597_v32 = vpop.f32.mrf.mxu0 }
0x110f   :  { %v1109_v2 = vadd.f32 %v1107_v30, %v1057_v28  ;;  %v1444_v28 = vld [vmem:[%s2227_s0 + $0x8] sm:$0x1] }
0x1110   :  { %v1103_v33 = vpop.f32.mrf.mxu0  ;;  %v1315_v3 = vunpack.c.l.bf16 %v1444_v28 }
0x1111   :  { %1728 = vtanh.f32 %v1109_v2  ;;  %v1438_v45 = vmul.f32 -1.442695, %v1109_v2 }
0x1112   :  { %v1598_v36 = vpop.f32.mrf.mxu0  ;;  %v1186_v0 = vpop.f32.mrf.mxu1 }
0x1113   :  { %v1193_v37 = vrot.slane %v1186_v0, 6 }
0x1114   :  { %v1605_v4 = vpop.f32.mrf.mxu1 }
0x1115   :  { %v1195_v39 = vadd.f32 %v1193_v37, %v1143_v35 }
0x1116   :  { %v1189_v40 = vpop.f32.mrf.mxu1 }
0x1117   :  { %1730 = vtanh.f32 %v1195_v39  ;;  %v1441_v46 = vmul.f32 -1.442695, %v1195_v39 }
0x1118   :  { %v1606_v41 = vpop.f32.mrf.mxu1  ;;  %1732 = vpow2.f32 %v1438_v45 }
0x1119   :  { %1734 = vpow2.f32 %v1441_v46 }
0x111e   :  { %v1729_v42 = vpop.eup %1728 }
0x111f   :  { %1122 = vrot.lane.b32.xlu0 %v1729_v42, %s1763_s20 }
0x1124   :  { %v1731_v43 = vpop.eup %1730 }
0x1125   :  { %1208 = vrot.lane.b32.xlu1 %v1731_v43, %s1763_s20  ;;  %v1733_v48 = vpop.eup %1732 }
0x1126   :  { %v1113_v49 = vadd.f32 1.0, %v1733_v48  ;;  %v1735_v50 = vpop.eup %1734 }
0x1127   :  { %v1199_v51 = vadd.f32 1.0, %v1735_v50 }
0x1128   :  { %1736 = vrcp.f32 %v1113_v49 }
0x1129   :  { %1738 = vrcp.f32 %v1199_v51 }
0x1135   :  { %v1737_v52 = vpop.eup %1736 }
0x1136   :  { %v1739_v55 = vpop.eup %1738  ;;  %v1120_v59 = vmul.f32 %v1737_v52, %v1118_v58 }
0x1137   :  { %v1206_v63 = vmul.f32 %v1739_v55, %v1204_v62 }
0x1191   :  { %v1123_v53 = vpop.permute.xlu0 %1122 }
0x1192   :  { %v1125_v54 = vmul.f32 %v1737_v52, %v1123_v53 }
0x1194   :  { %1127 = vrot.lane.b32.xlu0 %v1125_v54, %s1764_s21 }
0x1197   :  { %v1209_v56 = vpop.permute.xlu1 %1208 }
0x1198   :  { %v1211_v57 = vmul.f32 %v1739_v55, %v1209_v56 }
0x119a   :  { %1213 = vrot.lane.b32.xlu1 %v1211_v57, %s1764_s21 }
0x1206   :  { %v1128_v60 = vpop.permute.xlu0 %1127 }
0x1207   :  { %v2097_v61 = vadd.f32 %v1128_v60, %v1120_v59 }
0x1209   :  { %1740 = vtanh.f32 %v2097_v61 }
0x120c   :  { %v1214_v5 = vpop.permute.xlu1 %1213 }
0x120d   :  { %v2101_v7 = vadd.f32 %v1214_v5, %v1206_v63 }
0x120f   :  { %1742 = vtanh.f32 %v2101_v7  ;;  %v1373_v58 = vrot.slane %v2101_v7, 2 }
0x1216   :  { %v1741_v8 = vpop.eup %1740 }
0x1217   :  { %1133 = vrot.lane.b32.xlu0 %v1741_v8, %s1763_s20 }
0x121c   :  { %v1743_v10 = vpop.eup %1742 }
0x121d   :  { %1219 = vrot.lane.b32.xlu1 %v1743_v10, %s1763_s20 }
0x1289   :  { %v1134_v6 = vpop.permute.xlu0 %1133 }
0x128a   :  { %v2106_v13 = vmul.f32 %v1737_v52, %v1134_v6 }
0x128c   :  { %v1230_v11 = vpack.c.bf16 %v2106_v13, %v2106_v13 }
0x128e   :  { %v1232_v15 = vrot.slane %v1230_v11, 2 }
0x128f   :  { %v1220_v9 = vpop.permute.xlu1 %1219 }
0x1290   :  { %v2110_v12 = vmul.f32 %v1739_v55, %v1220_v9  ;;  %1233 = vrot.lane.b32.xlu0 %v1232_v15, %s1764_s21  ;;  %v1290_v55 = vrot.slane %v2097_v61, 6 }
0x1292   :  { %v1316_v17 = vpack.c.bf16 %v2110_v12, %v2110_v12 }
0x1294   :  { %v1318_v18 = vrot.slane %v1316_v17, 1 }
0x1296   :  { %1319 = vrot.lane.b32.xlu1 %v1318_v18, %s1764_s21 }
0x1302   :  { %v1234_v22 = vpop.permute.xlu0 %1233 }
0x1303   :  { %1612 = vmatmul.mubr.msk.bf16.vlgmr.msra.gmra.mxu0 %vm35_vm1, %v1234_v22 }
0x1308   :  { %v1320_v23 = vpop.permute.xlu1 %1319 }
0x1309   :  { %1620 = vmatmul.mubr.msk.bf16.vlgmr.msra.gmra.mxu1 %vm35_vm1, %v1320_v23 }
0x13c3   :  { %v1272_v1 = vpop.f32.mrf.mxu0 }
0x13c4   :  { %v1279_v29 = vrot.slane %v1272_v1, 2 }
0x13c5   :  { %v1613_v30 = vpop.f32.mrf.mxu0 }
0x13c6   :  { %v1281_v32 = vadd.f32 %v1279_v29, %v1229_v26 }
0x13c7   :  { %v1275_v2 = vpop.f32.mrf.mxu0 }
0x13c8   :  { %1744 = vtanh.f32 %v1281_v32  ;;  %v1443_v41 = vmul.f32 -1.442695, %v1281_v32 }
0x13c9   :  { %v1614_v33 = vpop.f32.mrf.mxu0  ;;  %v1358_v35 = vpop.f32.mrf.mxu1 }
0x13ca   :  { %v1364_v36 = vadd.f32 %v1358_v35, %v1315_v3 }
0x13cb   :  { %v1621_v0 = vpop.f32.mrf.mxu1 }
0x13cc   :  { %1746 = vtanh.f32 %v1364_v36  ;;  %v1446_v42 = vmul.f32 -1.442695, %v1364_v36 }
0x13cd   :  { %v1361_v37 = vpop.f32.mrf.mxu1  ;;  %1748 = vpow2.f32 %v1443_v41 }
0x13ce   :  { %1750 = vpow2.f32 %v1446_v42 }
0x13cf   :  { %v1622_v4 = vpop.f32.mrf.mxu1 }
0x13d5   :  { %v1745_v39 = vpop.eup %1744 }
0x13d6   :  { %1294 = vrot.lane.b32.xlu0 %v1745_v39, %s1763_s20 }
0x13d9   :  { %v1747_v40 = vpop.eup %1746 }
0x13da   :  { %1377 = vrot.lane.b32.xlu1 %v1747_v40, %s1763_s20  ;;  %v1749_v43 = vpop.eup %1748 }
0x13db   :  { %v1285_v45 = vadd.f32 1.0, %v1749_v43  ;;  %v1751_v46 = vpop.eup %1750 }
0x13dc   :  { %v1368_v48 = vadd.f32 1.0, %v1751_v46 }
0x13dd   :  { %1752 = vrcp.f32 %v1285_v45 }
0x13de   :  { %1754 = vrcp.f32 %v1368_v48 }
0x13ea   :  { %v1753_v49 = vpop.eup %1752 }
0x13eb   :  { %v1755_v52 = vpop.eup %1754  ;;  %v1292_v56 = vmul.f32 %v1753_v49, %v1290_v55 }
0x13ec   :  { %v1375_v60 = vmul.f32 %v1755_v52, %v1373_v58 }
0x1448   :  { %v1295_v50 = vpop.permute.xlu0 %1294 }
0x1449   :  { %v1297_v51 = vmul.f32 %v1753_v49, %v1295_v50 }
0x144b   :  { %1299 = vrot.lane.b32.xlu0 %v1297_v51, %s1764_s21 }
0x144c   :  { %v1378_v53 = vpop.permute.xlu1 %1377 }
0x144d   :  { %v1380_v54 = vmul.f32 %v1755_v52, %v1378_v53 }
0x144f   :  { %1382 = vrot.lane.b32.xlu1 %v1380_v54, %s1764_s21 }
0x14bd   :  { %v1300_v57 = vpop.permute.xlu0 %1299 }
0x14be   :  { %v1302_v59 = vadd.f32 %v1300_v57, %v1292_v56 }
0x14c0   :  { %1756 = vtanh.f32 %v1302_v59 }
0x14c1   :  { %v1383_v62 = vpop.permute.xlu1 %1382 }
0x14c2   :  { %v1385_v63 = vadd.f32 %v1383_v62, %v1375_v60 }
0x14c4   :  { %1758 = vtanh.f32 %v1385_v63 }
0x14cd   :  { %v1757_v5 = vpop.eup %1756 }
0x14ce   :  { %1305 = vrot.lane.b32.xlu0 %v1757_v5, %s1763_s20 }
0x14d1   :  { %v1759_v8 = vpop.eup %1758 }
0x14d2   :  { %1388 = vrot.lane.b32.xlu1 %v1759_v8, %s1763_s20  ;;  %105 = vrot.lane.b32.xlu0 %v1844_v44, %s1764_s21 }
0x14d6   :  { %194 = vrot.lane.b32.xlu1 %v1848_v47, %s1763_s20  ;;  %280 = vrot.lane.b32.xlu0 %v1888_v34, %s1764_s21 }
0x14da   :  { %367 = vrot.lane.b32.xlu1 %v1892_v38, %s1763_s20  ;;  %454 = vrot.lane.b32.xlu0 %v1932_v27, %s1764_s21 }
0x14de   :  { %541 = vrot.lane.b32.xlu1 %v1936_v31, %s1763_s20  ;;  %628 = vrot.lane.b32.xlu0 %v1976_v21, %s1764_s21 }
0x14e2   :  { %712 = vrot.lane.b32.xlu1 %v1980_v25, %s1763_s20  ;;  %796 = vrot.lane.b32.xlu0 %v2020_v16, %s1764_s21 }
0x14e6   :  { %881 = vrot.lane.b32.xlu1 %v2024_v20, %s1763_s20  ;;  %966 = vrot.lane.b32.xlu0 %v2064_v14, %s1764_s21 }
0x14ea   :  { %1052 = vrot.lane.b32.xlu1 %v2068_v19, %s1763_s20  ;;  %1138 = vrot.lane.b32.xlu0 %v2106_v13, %s1764_s21 }
0x14ee   :  { %1224 = vrot.lane.b32.xlu1 %v2110_v12, %s1763_s20 }
0x1540   :  { %v1306_v44 = vpop.permute.xlu0 %1305 }
0x1541   :  { %v1308_v47 = vmul.f32 %v1753_v49, %v1306_v44 }
0x1543   :  { %1310 = vrot.lane.b32.xlu0 %v1308_v47, %s1764_s21 }
0x1544   :  { %v1389_v34 = vpop.permute.xlu1 %1388  ;;  %v106_v38 = vpop.permute.xlu0 %105 }
0x1545   :  { %v1391_v27 = vmul.f32 %v1755_v52, %v1389_v34  ;;  %109 = vst.msk [vmem:[%s2228_s2] sm:$0x3] %vm108_vm2, %v106_v38 }
0x1547   :  { %1393 = vrot.lane.b32.xlu1 %v1391_v27, %s1763_s20 }
0x1548   :  { %v195_v31 = vpop.permute.xlu1 %194  ;;  %v281_v21 = vpop.permute.xlu0 %280 }
0x1549   :  { %198 = vst.msk [vmem:[%s2228_s2 + $0x8] sm:$0xc0] %vm197_vm3, %v195_v31 }
0x154a   :  { %284 = vst.msk [vmem:[%s2228_s2] sm:$0xc] %vm283_vm4, %v281_v21 }
0x154c   :  { %v368_v25 = vpop.permute.xlu1 %367  ;;  %v455_v16 = vpop.permute.xlu0 %454 }
0x154d   :  { %371 = vst.msk [vmem:[%s2228_s2 + $0x8] sm:$0x30] %vm370_vm5, %v368_v25 }
0x154e   :  { %458 = vst.msk [vmem:[%s2228_s2] sm:$0x30] %vm457_vm6, %v455_v16 }
0x1550   :  { %v542_v20 = vpop.permute.xlu1 %541  ;;  %v629_v14 = vpop.permute.xlu0 %628 }
0x1551   :  { %545 = vst.msk [vmem:[%s2228_s2 + $0x8] sm:$0xc] %vm544_vm7, %v542_v20 }
0x1552   :  { %632 = vst.msk [vmem:[%s2228_s2] sm:$0xc0] %vm631_vm8, %v629_v14 }
0x1554   :  { %v713_v19 = vpop.permute.xlu1 %712  ;;  %v797_v61 = vpop.permute.xlu0 %796 }
0x1555   :  { %716 = vst.msk [vmem:[%s2228_s2 + $0x8] sm:$0x3] %vm715_vm9, %v713_v19 }
0x1556   :  { %799 = vst.msk [vmem:[%s2228_s2 + $0x8] sm:$0x3] %vm108_vm2, %v797_v61 }
0x1558   :  { %v882_v7 = vpop.permute.xlu1 %881  ;;  %v967_v10 = vpop.permute.xlu0 %966 }
0x1559   :  { %884 = vst.msk [vmem:[%s2228_s2] sm:$0xc0] %vm197_vm3, %v882_v7 }
0x155a   :  { %969 = vst.msk [vmem:[%s2228_s2 + $0x8] sm:$0xc] %vm283_vm4, %v967_v10 }
0x155c   :  { %v1053_v6 = vpop.permute.xlu1 %1052  ;;  %v1139_v13 = vpop.permute.xlu0 %1138 }
0x155d   :  { %1055 = vst.msk [vmem:[%s2228_s2] sm:$0x30] %vm370_vm5, %v1053_v6 }
0x155e   :  { %1141 = vst.msk [vmem:[%s2228_s2 + $0x8] sm:$0x30] %vm457_vm6, %v1139_v13 }
0x1560   :  { %v1225_v11 = vpop.permute.xlu1 %1224 }
0x1561   :  { %1227 = vst.msk [vmem:[%s2228_s2] sm:$0xc] %vm544_vm7, %v1225_v11 }
0x15b5   :  { %v1311_v15 = vpop.permute.xlu0 %1310 }
0x15b6   :  { %1313 = vst.msk [vmem:[%s2228_s2 + $0x8] sm:$0xc0] %vm631_vm8, %v1311_v15 }
0x15b9   :  { %v1394_v9 = vpop.permute.xlu1 %1393 }
0x15ba   :  { %1396 = vst.msk [vmem:[%s2228_s2] sm:$0x3] %vm715_vm9, %v1394_v9 }

</bundles_post_ra>
